<compile_context>
chip_gen: v7x
topology: tpu7x:2x2x1
jax: 0.10.0
libtpu: 0.0.40
codegen_flags: <defaults>
</compile_context>

<pallas_src>
import functools

import jax
import jax.numpy as jnp
from jax.experimental import pallas as pl
from jax.experimental.pallas import tpu as pltpu


# ------------------------------ small helpers ------------------------------

def _tile(dim, target):
    """Largest power-of-two-ish divisor of `dim` that is <= target, else full dim."""
    if dim <= target:
        return dim
    t = target
    while t >= 8:
        if dim % t == 0:
            return t
        t //= 2
    return dim


def _gelu(x):
    # tanh-approximate GELU (EUP transcendental path on TPU).
    # TODO(synk): HF/PyTorch BERT default is exact erf-GELU; tanh approx differs ~1e-3.
    c = jnp.asarray(0.7978845608028654, x.dtype)  # sqrt(2/pi)
    return 0.5 * x * (1.0 + jnp.tanh(c * (x + 0.044715 * x * x * x)))


_MOSAIC_PARAMS = dict(vmem_limit_bytes=48 * 1024 * 1024)


# ------------------------- tiled linear (+bias/act) -------------------------

def _linear_kernel(x_ref, w_ref, b_ref, o_ref, acc_ref, *, act):
    k = pl.program_id(2)

    @pl.when(k == 0)
    def _():
        acc_ref[...] = jnp.zeros_like(acc_ref)

    acc_ref[...] += jnp.dot(x_ref[...], w_ref[...],
                            preferred_element_type=jnp.float32)

    @pl.when(k == pl.num_programs(2) - 1)
    def _():
        y = acc_ref[...] + b_ref[...]
        if act == "gelu":
            y = _gelu(y)
        elif act == "tanh":
            y = jnp.tanh(y)
        o_ref[...] = y.astype(o_ref.dtype)


def linear(x, w, b, act="none", out_dtype=jnp.bfloat16,
           tm_t=256, tn_t=256, tk_t=512):
    """y = act(x @ w + b), tiled K-reduction matmul with f32 accumulation."""
    M, K = x.shape
    N = w.shape[1]
    tm, tn, tk = _tile(M, tm_t), _tile(N, tn_t), _tile(K, tk_t)
    grid = (M // tm, N // tn, K // tk)
    return pl.pallas_call(
        functools.partial(_linear_kernel, act=act),
        out_shape=jax.ShapeDtypeStruct((M, N), out_dtype),
        grid_spec=pltpu.PrefetchScalarGridSpec(
            num_scalar_prefetch=0,
            grid=grid,
            in_specs=[
                pl.BlockSpec((tm, tk), lambda i, j, k: (i, k)),
                pl.BlockSpec((tk, tn), lambda i, j, k: (k, j)),
                pl.BlockSpec((1, tn), lambda i, j, k: (0, j)),
            ],
            out_specs=pl.BlockSpec((tm, tn), lambda i, j, k: (i, j)),
            scratch_shapes=[pltpu.VMEM((tm, tn), jnp.float32)],
        ),
        compiler_params=pltpu.CompilerParams(
            dimension_semantics=("parallel", "parallel", "arbitrary"),
            **_MOSAIC_PARAMS),
    )(x, w, b)


# -------------- tiled linear fused with residual-add + layernorm ------------

def _linear_add_ln_kernel(x_ref, w_ref, b_ref, r_ref, g_ref, bln_ref,
                          o_ref, acc_ref, *, eps):
    k = pl.program_id(1)

    @pl.when(k == 0)
    def _():
        acc_ref[...] = jnp.zeros_like(acc_ref)

    acc_ref[...] += jnp.dot(x_ref[...], w_ref[...],
                            preferred_element_type=jnp.float32)

    @pl.when(k == pl.num_programs(1) - 1)
    def _():
        y = acc_ref[...] + b_ref[...] + r_ref[...].astype(jnp.float32)
        mu = jnp.mean(y, axis=-1, keepdims=True)
        var = jnp.mean((y - mu) * (y - mu), axis=-1, keepdims=True)
        o_ref[...] = ((y - mu) * jax.lax.rsqrt(var + eps) * g_ref[...]
                      + bln_ref[...]).astype(o_ref.dtype)


def linear_add_layernorm(x, w, b, residual, g, bln, eps=1e-12,
                         out_dtype=jnp.bfloat16, tm_t=256, tk_t=512):
    """layernorm((x @ w + b) + residual) — LN over the full output row (N)."""
    M, K = x.shape
    N = w.shape[1]
    tm, tk = _tile(M, tm_t), _tile(K, tk_t)
    grid = (M // tm, K // tk)
    return pl.pallas_call(
        functools.partial(_linear_add_ln_kernel, eps=eps),
        out_shape=jax.ShapeDtypeStruct((M, N), out_dtype),
        grid_spec=pltpu.PrefetchScalarGridSpec(
            num_scalar_prefetch=0,
            grid=grid,
            in_specs=[
                pl.BlockSpec((tm, tk), lambda i, k: (i, k)),
                pl.BlockSpec((tk, N), lambda i, k: (k, 0)),
                pl.BlockSpec((1, N), lambda i, k: (0, 0)),
                pl.BlockSpec((tm, N), lambda i, k: (i, 0)),
                pl.BlockSpec((1, N), lambda i, k: (0, 0)),
                pl.BlockSpec((1, N), lambda i, k: (0, 0)),
            ],
            out_specs=pl.BlockSpec((tm, N), lambda i, k: (i, 0)),
            scratch_shapes=[pltpu.VMEM((tm, N), jnp.float32)],
        ),
        compiler_params=pltpu.CompilerParams(
            dimension_semantics=("parallel", "arbitrary"),
            **_MOSAIC_PARAMS),
    )(x, w, b, residual, g, bln)


# ---------------- fused embedding-sum + layernorm (per batch) ---------------

def _embed_ln_kernel(we_ref, te_ref, pe_ref, g_ref, b_ref, o_ref, *, eps):
    x = (we_ref[0] + te_ref[0] + pe_ref[...]).astype(jnp.float32)   # (S, H)
    mu = jnp.mean(x, axis=-1, keepdims=True)
    var = jnp.mean((x - mu) * (x - mu), axis=-1, keepdims=True)
    o_ref[0] = ((x - mu) * jax.lax.rsqrt(var + eps) * g_ref[...]
                + b_ref[...]).astype(o_ref.dtype)


def embed_add_layernorm(word_e, type_e, pos_e, g, b, eps=1e-12,
                        out_dtype=jnp.bfloat16):
    """layernorm(word_emb + type_emb + pos_emb) fused in one pass over HBM."""
    B, S, H = word_e.shape
    return pl.pallas_call(
        functools.partial(_embed_ln_kernel, eps=eps),
        out_shape=jax.ShapeDtypeStruct((B, S, H), out_dtype),
        grid=(B,),
        in_specs=[
            pl.BlockSpec((1, S, H), lambda i: (i, 0, 0)),
            pl.BlockSpec((1, S, H), lambda i: (i, 0, 0)),
            pl.BlockSpec((S, H), lambda i: (0, 0)),
            pl.BlockSpec((1, H), lambda i: (0, 0)),
            pl.BlockSpec((1, H), lambda i: (0, 0)),
        ],
        out_specs=pl.BlockSpec((1, S, H), lambda i: (i, 0, 0)),
        compiler_params=pltpu.CompilerParams(
            dimension_semantics=("parallel",), **_MOSAIC_PARAMS),
    )(word_e, type_e, pos_e, g, b)


# -------------------------------- attention ---------------------------------

def _attn_kernel(qkv_ref, m_ref, o_ref, *, nheads, dh, scale):
    H = nheads * dh
    qkv = qkv_ref[0]                    # (S, 3H) bf16 — fused QKV slab
    m = m_ref[0]                        # (1, S) additive mask, f32
    scale = jnp.asarray(scale, qkv.dtype)
    outs = []
    for h in range(nheads):             # static unroll; heads read via lane slices
        q = qkv[:, h * dh:(h + 1) * dh] * scale          # pre-scale Q (S*dh ops)
        k = qkv[:, H + h * dh:H + (h + 1) * dh]
        v = qkv[:, 2 * H + h * dh:2 * H + (h + 1) * dh]
        s = jnp.dot(q, k.T, preferred_element_type=jnp.float32) + m
        s = s - jnp.max(s, axis=-1, keepdims=True)
        p = jnp.exp(s)
        p = p * pl.reciprocal(jnp.sum(p, axis=-1, keepdims=True), approx=True)
        outs.append(jnp.dot(p.astype(v.dtype), v,
                            preferred_element_type=jnp.float32))
    # single lane-dense (S, H) store with heads merged on the lane axis
    o_ref[0] = jnp.concatenate(outs, axis=-1).astype(o_ref.dtype)


def attention(qkv, ext_mask, nheads):
    # qkv: (B, S, 3H) bf16; ext_mask: (B, 1, S) additive (-1e4 on padding)
    # TODO(synk): for long sequences switch to flash-style K/V streaming with an
    # online softmax (grid axis over kv blocks) to bound the SxS score matrix.
    B, S, threeH = qkv.shape
    H = threeH // 3
    dh = H // nheads
    scale = 1.0 / float(dh) ** 0.5
    return pl.pallas_call(
        functools.partial(_attn_kernel, nheads=nheads, dh=dh, scale=scale),
        out_shape=jax.ShapeDtypeStruct((B, S, H), jnp.bfloat16),
        grid=(B,),
        in_specs=[
            pl.BlockSpec((1, S, threeH), lambda b: (b, 0, 0)),
            pl.BlockSpec((1, 1, S), lambda b: (b, 0, 0)),
        ],
        out_specs=pl.BlockSpec((1, S, H), lambda b: (b, 0, 0)),
        compiler_params=pltpu.CompilerParams(
            dimension_semantics=("parallel",), **_MOSAIC_PARAMS),
    )(qkv, ext_mask)


# ----------------------- fused pooler + classifier head ---------------------

def _pooler_head_kernel(cls_ref, pw_ref, pb_ref, fw_ref, fb_ref, o_ref):
    # pooler: tanh(cls @ Wp + bp)
    pooled = jnp.tanh(
        jnp.dot(cls_ref[...], pw_ref[...], preferred_element_type=jnp.float32)
        + pb_ref[...])
    # head: Linear(H, 2) -> ReLU -> Dropout(identity in eval) -> Softmax(dim=1)
    logits = jnp.dot(pooled.astype(fw_ref.dtype), fw_ref[...],
                     preferred_element_type=jnp.float32) + fb_ref[...]
    logits = jnp.maximum(logits, 0.0)
    # TODO(synk): nn.Dropout(config.dropout) is identity in eval mode; training-mode
    # stochastic dropout is not applied here.
    logits = logits - jnp.max(logits, axis=1, keepdims=True)
    e = jnp.exp(logits)
    o_ref[...] = e / jnp.sum(e, axis=1, keepdims=True)


def pooler_and_head(cls, pool_w, pool_b, fc_w, fc_b):
    B = cls.shape[0]
    return pl.pallas_call(
        _pooler_head_kernel,
        out_shape=jax.ShapeDtypeStruct((B, fc_w.shape[1]), jnp.float32),
    )(cls, pool_w, pool_b, fc_w, fc_b)


# ------------------------- deterministic parameters --------------------------

CFG = dict(vocab=100, hidden=32, heads=2, inter=64, layers=2,
           max_pos=16, type_vocab=2)


def init_params(key, cfg):
    H, I = cfg["hidden"], cfg["inter"]
    ks = iter(jax.random.split(key, 64))
    wbf = lambda shape: (0.02 * jax.random.normal(next(ks), shape)).astype(jnp.bfloat16)
    wf32 = lambda shape: (0.02 * jax.random.normal(next(ks), shape)).astype(jnp.float32)
    zeros = lambda shape: jnp.zeros(shape, jnp.float32)
    ones = lambda shape: jnp.ones(shape, jnp.float32)

    params = dict(
        word_emb=wf32((cfg["vocab"], H)),
        pos_emb=wf32((cfg["max_pos"], H)),
        type_emb=wf32((cfg["type_vocab"], H)),
        emb_ln_g=ones((1, H)), emb_ln_b=zeros((1, H)),
        pool_w=wbf((H, H)), pool_b=zeros((1, H)),
        fc_w=wbf((H, 2)), fc_b=zeros((1, 2)),
        layers=[],
    )
    for _ in range(cfg["layers"]):
        params["layers"].append(dict(
            wqkv=wbf((H, 3 * H)), bqkv=zeros((1, 3 * H)),
            wo=wbf((H, H)), bo=zeros((1, H)),
            ln1_g=ones((1, H)), ln1_b=zeros((1, H)),
            w1=wbf((H, I)), b1=zeros((1, I)),
            w2=wbf((I, H)), b2=zeros((1, H)),
            ln2_g=ones((1, H)), ln2_b=zeros((1, H)),
        ))
    return params


# -------------------------------- forward pass -------------------------------

def bert_with_head_forward(params, input_ids, attention_mask, token_type_ids, cfg):
    B, S = input_ids.shape
    H, nH = cfg["hidden"], cfg["heads"]

    # embedding gathers are plain-JAX glue; sum + LayerNorm fused in one kernel
    word_e = params["word_emb"][input_ids]                            # (B, S, H) f32
    type_e = params["type_emb"][token_type_ids]                       # (B, S, H) f32
    pos_e = params["pos_emb"][:S]                                     # (S, H)    f32
    x = embed_add_layernorm(word_e, type_e, pos_e,
                            params["emb_ln_g"], params["emb_ln_b"])   # (B, S, H) bf16
    x = x.reshape(B * S, H)                                           # free reshape

    # additive attention mask (B, 1, S)
    ext_mask = (1.0 - attention_mask.astype(jnp.float32))[:, None, :] * -1e4

    for lp in params["layers"]:
        # fused QKV projection (== 3 separate nn.Linear layers)
        qkv = linear(x, lp["wqkv"], lp["bqkv"])                       # (B*S, 3H) bf16

        # attention reads QKV in-place (lane slices per head), writes (B, S, H)
        ctx = attention(qkv.reshape(B, S, 3 * H), ext_mask, nH)       # (B, S, H) bf16

        # output projection fused with residual-add + LayerNorm1
        x = linear_add_layernorm(ctx.reshape(B * S, H), lp["wo"], lp["bo"],
                                 x, lp["ln1_g"], lp["ln1_b"])

        # FFN up-projection with fused bias + GELU
        h = linear(x, lp["w1"], lp["b1"], act="gelu")                 # (B*S, I) bf16

        # FFN down-projection fused with residual-add + LayerNorm2
        x = linear_add_layernorm(h, lp["w2"], lp["b2"],
                                 x, lp["ln2_g"], lp["ln2_b"])

    # pooler(tanh on [CLS]) + classification head fused in one kernel
    cls = x.reshape(B, S, H)[:, 0, :]                                 # (B, H) bf16
    return pooler_and_head(cls, params["pool_w"], params["pool_b"],
                           params["fc_w"], params["fc_b"])            # (B, 2) f32


# ------------------------------------ main -----------------------------------

if __name__ == "__main__":
    key = jax.random.PRNGKey(0)
    k_params, k_ids, k_types = jax.random.split(key, 3)

    B, S = 2, 8
    params = init_params(k_params, CFG)

    input_ids = jax.random.randint(k_ids, (B, S), 0, CFG["vocab"], dtype=jnp.int32)
    # first sequence fully valid, second has 2 padded positions
    attention_mask = jnp.array(
        [[1, 1, 1, 1, 1, 1, 1, 1],
         [1, 1, 1, 1, 1, 1, 0, 0]], dtype=jnp.int32)
    token_type_ids = jax.random.randint(k_types, (B, S), 0, CFG["type_vocab"],
                                        dtype=jnp.int32)

    fwd = jax.jit(functools.partial(bert_with_head_forward, cfg=CFG))
    probs = fwd(params, input_ids, attention_mask, token_type_ids)
    probs = jax.block_until_ready(probs)

    assert probs.shape == (B, 2)
    print("KERNEL_OK")
</pallas_src>

<mosaic_0001>
module attributes {stable_mosaic.version = 11 : i64} {
  func.func @_linear_kernel(%arg0: i32, %arg1: i32, %arg2: i32, %arg3: memref<16x32xbf16, #tpu.memory_space<vmem>>, %arg4: memref<32x96xbf16, #tpu.memory_space<vmem>>, %arg5: memref<1x96xf32, #tpu.memory_space<vmem>>, %arg6: memref<16x96xbf16, #tpu.memory_space<vmem>>, %arg7: memref<16x96xf32, #tpu.memory_space<vmem>>) attributes {dimension_semantics = [#tpu.dimension_semantics<parallel>, #tpu.dimension_semantics<parallel>, #tpu.dimension_semantics<arbitrary>], iteration_bounds = array<i64: 1, 1, 1>, scalar_prefetch = 0 : i64, scratch_operands = 1 : i64, tpu.core_type = #tpu.core_type<tc>, window_params = [{transform_indices = @transform_0, window_bounds = array<i64: 16, 32>}, {transform_indices = @transform_1, window_bounds = array<i64: 32, 96>}, {transform_indices = @transform_2, window_bounds = array<i64: 1, 96>}, {transform_indices = @transform_3, window_bounds = array<i64: 16, 96>}]} {
    %c0_i32 = arith.constant 0 : i32
    %0 = arith.cmpi eq, %arg2, %c0_i32 : i32
    %1 = arith.extui %0 : i1 to i32
    %c0_i32_0 = arith.constant 0 : i32
    %2 = arith.cmpi ne, %1, %c0_i32_0 : i32
    scf.if %2 {
      %cst_10 = arith.constant 0.000000e+00 : f32
      %12 = vector.broadcast %cst_10 : f32 to vector<16x96xf32>
      %c0_11 = arith.constant 0 : index
      %c0_12 = arith.constant 0 : index
      %13 = vector.load %arg7[%c0_11, %c0_12] : memref<16x96xf32, #tpu.memory_space<vmem>>, vector<16x96xf32>
      tpu.vector_store %arg7[%c0_11, %c0_12], %12 {strides = array<i32>} : memref<16x96xf32, #tpu.memory_space<vmem>>, vector<16x96xf32>,
    } else {
    }
    %c0 = arith.constant 0 : index
    %c0_1 = arith.constant 0 : index
    %3 = vector.load %arg7[%c0, %c0_1] : memref<16x96xf32, #tpu.memory_space<vmem>>, vector<16x96xf32>
    %c0_2 = arith.constant 0 : index
    %c0_3 = arith.constant 0 : index
    %4 = vector.load %arg3[%c0_2, %c0_3] : memref<16x32xbf16, #tpu.memory_space<vmem>>, vector<16x32xbf16>
    %c0_4 = arith.constant 0 : index
    %c0_5 = arith.constant 0 : index
    %5 = vector.load %arg4[%c0_4, %c0_5] : memref<32x96xbf16, #tpu.memory_space<vmem>>, vector<32x96xbf16>
    %cst = arith.constant dense<0.000000e+00> : vector<16x96xf32>
    %6 = tpu.matmul %4, %5, %cst {dimension_numbers = #tpu.dot_dimension_numbers<[1], [0], [0], [1], [0, 0, 1, 1], [], []>} : vector<16x32xbf16>, vector<32x96xbf16>, vector<16x96xf32> -> vector<16x96xf32>
    %7 = arith.addf %3, %6 : vector<16x96xf32>
    %c0_6 = arith.constant 0 : index
    %c0_7 = arith.constant 0 : index
    %8 = vector.load %arg7[%c0_6, %c0_7] : memref<16x96xf32, #tpu.memory_space<vmem>>, vector<16x96xf32>
    tpu.vector_store %arg7[%c0_6, %c0_7], %7 {strides = array<i32>} : memref<16x96xf32, #tpu.memory_space<vmem>>, vector<16x96xf32>,
    %c0_i32_8 = arith.constant 0 : i32
    %9 = arith.cmpi eq, %arg2, %c0_i32_8 : i32
    %10 = arith.extui %9 : i1 to i32
    %c0_i32_9 = arith.constant 0 : i32
    %11 = arith.cmpi ne, %10, %c0_i32_9 : i32
    scf.if %11 {
      %c0_10 = arith.constant 0 : index
      %c0_11 = arith.constant 0 : index
      %12 = vector.load %arg7[%c0_10, %c0_11] : memref<16x96xf32, #tpu.memory_space<vmem>>, vector<16x96xf32>
      %c0_12 = arith.constant 0 : index
      %c0_13 = arith.constant 0 : index
      %13 = vector.load %arg5[%c0_12, %c0_13] : memref<1x96xf32, #tpu.memory_space<vmem>>, vector<1x96xf32>
      %14 = vector.broadcast %13 : vector<1x96xf32> to vector<16x96xf32>
      %15 = arith.addf %12, %14 : vector<16x96xf32>
      %16 = arith.truncf %15 : vector<16x96xf32> to vector<16x96xbf16>
      %c0_14 = arith.constant 0 : index
      %c0_15 = arith.constant 0 : index
      %17 = vector.load %arg6[%c0_14, %c0_15] : memref<16x96xbf16, #tpu.memory_space<vmem>>, vector<16x96xbf16>
      tpu.vector_store %arg6[%c0_14, %c0_15], %16 {strides = array<i32>} : memref<16x96xbf16, #tpu.memory_space<vmem>>, vector<16x96xbf16>,
    } else {
    }
    return
  }
  func.func @transform_0(%arg0: i32, %arg1: i32, %arg2: i32) -> (i32, i32) {
    %c0_i32 = arith.constant 0 : i32
    return %arg0, %arg2 : i32, i32
  }
  func.func @transform_1(%arg0: i32, %arg1: i32, %arg2: i32) -> (i32, i32) {
    %c0_i32 = arith.constant 0 : i32
    return %arg2, %arg1 : i32, i32
  }
  func.func @transform_2(%arg0: i32, %arg1: i32, %arg2: i32) -> (i32, i32) {
    %c0_i32 = arith.constant 0 : i32
    %c0_i32_0 = arith.constant 0 : i32
    return %c0_i32, %arg1 : i32, i32
  }
  func.func @transform_3(%arg0: i32, %arg1: i32, %arg2: i32) -> (i32, i32) {
    %c0_i32 = arith.constant 0 : i32
    return %arg0, %arg1 : i32, i32
  }
}

module attributes {stable_mosaic.version = 11 : i64} {
  func.func @_embed_ln_kernel(%arg0: i32, %arg1: memref<1x8x32xf32, #tpu.memory_space<vmem>>, %arg2: memref<1x8x32xf32, #tpu.memory_space<vmem>>, %arg3: memref<8x32xf32, #tpu.memory_space<vmem>>, %arg4: memref<1x32xf32, #tpu.memory_space<vmem>>, %arg5: memref<1x32xf32, #tpu.memory_space<vmem>>, %arg6: memref<1x8x32xbf16, #tpu.memory_space<vmem>>) attributes {dimension_semantics = [#tpu.dimension_semantics<parallel>], iteration_bounds = array<i64: 2>, scalar_prefetch = 0 : i64, scratch_operands = 0 : i64, tpu.core_type = #tpu.core_type<tc>, window_params = [{transform_indices = @transform_0, window_bounds = array<i64: 1, 8, 32>}, {transform_indices = @transform_1, window_bounds = array<i64: 1, 8, 32>}, {pipeline_mode = #tpu.pipeline_mode<synchronous>, transform_indices = @transform_2, window_bounds = array<i64: 8, 32>}, {pipeline_mode = #tpu.pipeline_mode<synchronous>, transform_indices = @transform_3, window_bounds = array<i64: 1, 32>}, {pipeline_mode = #tpu.pipeline_mode<synchronous>, transform_indices = @transform_4, window_bounds = array<i64: 1, 32>}, {transform_indices = @transform_5, window_bounds = array<i64: 1, 8, 32>}]} {
    %c0 = arith.constant 0 : index
    %c0_0 = arith.constant 0 : index
    %c0_1 = arith.constant 0 : index
    %0 = vector.load %arg1[%c0, %c0_0, %c0_1] : memref<1x8x32xf32, #tpu.memory_space<vmem>>, vector<1x8x32xf32>
    %1 = vector.shape_cast %0 : vector<1x8x32xf32> to vector<8x32xf32>
    %c0_2 = arith.constant 0 : index
    %c0_3 = arith.constant 0 : index
    %c0_4 = arith.constant 0 : index
    %2 = vector.load %arg2[%c0_2, %c0_3, %c0_4] : memref<1x8x32xf32, #tpu.memory_space<vmem>>, vector<1x8x32xf32>
    %3 = vector.shape_cast %2 : vector<1x8x32xf32> to vector<8x32xf32>
    %4 = arith.addf %1, %3 : vector<8x32xf32>
    %c0_5 = arith.constant 0 : index
    %c0_6 = arith.constant 0 : index
    %5 = vector.load %arg3[%c0_5, %c0_6] : memref<8x32xf32, #tpu.memory_space<vmem>>, vector<8x32xf32>
    %6 = arith.addf %4, %5 : vector<8x32xf32>
    %cst = arith.constant dense<0.000000e+00> : vector<8xf32>
    %7 = vector.multi_reduction <add>, %6, %cst [1] : vector<8x32xf32> to vector<8xf32>
    %8 = vector.shape_cast %7 : vector<8xf32> to vector<8x1xf32>
    %cst_7 = arith.constant 3.200000e+01 : f32
    %9 = vector.broadcast %cst_7 : f32 to vector<8x1xf32>
    %10 = arith.divf %8, %9 : vector<8x1xf32>
    %11 = vector.broadcast %10 : vector<8x1xf32> to vector<8x32xf32>
    %12 = arith.subf %6, %11 : vector<8x32xf32>
    %13 = vector.broadcast %10 : vector<8x1xf32> to vector<8x32xf32>
    %14 = arith.subf %6, %13 : vector<8x32xf32>
    %15 = arith.mulf %12, %14 : vector<8x32xf32>
    %cst_8 = arith.constant dense<0.000000e+00> : vector<8xf32>
    %16 = vector.multi_reduction <add>, %15, %cst_8 [1] : vector<8x32xf32> to vector<8xf32>
    %17 = vector.shape_cast %16 : vector<8xf32> to vector<8x1xf32>
    %cst_9 = arith.constant 3.200000e+01 : f32
    %18 = vector.broadcast %cst_9 : f32 to vector<8x1xf32>
    %19 = arith.divf %17, %18 : vector<8x1xf32>
    %20 = vector.broadcast %10 : vector<8x1xf32> to vector<8x32xf32>
    %21 = arith.subf %6, %20 : vector<8x32xf32>
    %cst_10 = arith.constant 9.99999996E-13 : f32
    %22 = vector.broadcast %cst_10 : f32 to vector<8x1xf32>
    %23 = arith.addf %19, %22 : vector<8x1xf32>
    %24 = math.rsqrt %23 : vector<8x1xf32>
    %25 = vector.broadcast %24 : vector<8x1xf32> to vector<8x32xf32>
    %26 = arith.mulf %21, %25 : vector<8x32xf32>
    %c0_11 = arith.constant 0 : index
    %c0_12 = arith.constant 0 : index
    %27 = vector.load %arg4[%c0_11, %c0_12] : memref<1x32xf32, #tpu.memory_space<vmem>>, vector<1x32xf32>
    %28 = vector.broadcast %27 : vector<1x32xf32> to vector<8x32xf32>
    %29 = arith.mulf %26, %28 : vector<8x32xf32>
    %c0_13 = arith.constant 0 : index
    %c0_14 = arith.constant 0 : index
    %30 = vector.load %arg5[%c0_13, %c0_14] : memref<1x32xf32, #tpu.memory_space<vmem>>, vector<1x32xf32>
    %31 = vector.broadcast %30 : vector<1x32xf32> to vector<8x32xf32>
    %32 = arith.addf %29, %31 : vector<8x32xf32>
    %33 = arith.truncf %32 : vector<8x32xf32> to vector<8x32xbf16>
    %c0_15 = arith.constant 0 : index
    %c0_16 = arith.constant 0 : index
    %c0_17 = arith.constant 0 : index
    %34 = vector.load %arg6[%c0_15, %c0_16, %c0_17] : memref<1x8x32xbf16, #tpu.memory_space<vmem>>, vector<1x8x32xbf16>
    %35 = vector.shape_cast %34 : vector<1x8x32xbf16> to vector<8x32xbf16>
    %36 = vector.shape_cast %33 : vector<8x32xbf16> to vector<1x8x32xbf16>
    tpu.vector_store %arg6[%c0_15, %c0_16, %c0_17], %36 {strides = array<i32>} : memref<1x8x32xbf16, #tpu.memory_space<vmem>>, vector<1x8x32xbf16>,
    return
  }
  func.func @transform_0(%arg0: i32) -> (i32, i32, i32) {
    %c0_i32 = arith.constant 0 : i32
    %c0_i32_0 = arith.constant 0 : i32
    %c0_i32_1 = arith.constant 0 : i32
    return %arg0, %c0_i32, %c0_i32_0 : i32, i32, i32
  }
  func.func @transform_1(%arg0: i32) -> (i32, i32, i32) {
    %c0_i32 = arith.constant 0 : i32
    %c0_i32_0 = arith.constant 0 : i32
    %c0_i32_1 = arith.constant 0 : i32
    return %arg0, %c0_i32, %c0_i32_0 : i32, i32, i32
  }
  func.func @transform_2(%arg0: i32) -> (i32, i32) {
    %c0_i32 = arith.constant 0 : i32
    %c0_i32_0 = arith.constant 0 : i32
    %c0_i32_1 = arith.constant 0 : i32
    return %c0_i32, %c0_i32_0 : i32, i32
  }
  func.func @transform_3(%arg0: i32) -> (i32, i32) {
    %c0_i32 = arith.constant 0 : i32
    %c0_i32_0 = arith.constant 0 : i32
    %c0_i32_1 = arith.constant 0 : i32
    return %c0_i32, %c0_i32_0 : i32, i32
  }
  func.func @transform_4(%arg0: i32) -> (i32, i32) {
    %c0_i32 = arith.constant 0 : i32
    %c0_i32_0 = arith.constant 0 : i32
    %c0_i32_1 = arith.constant 0 : i32
    return %c0_i32, %c0_i32_0 : i32, i32
  }
  func.func @transform_5(%arg0: i32) -> (i32, i32, i32) {
    %c0_i32 = arith.constant 0 : i32
    %c0_i32_0 = arith.constant 0 : i32
    %c0_i32_1 = arith.constant 0 : i32
    return %arg0, %c0_i32, %c0_i32_0 : i32, i32, i32
  }
}

module attributes {stable_mosaic.version = 11 : i64} {
  func.func @_attn_kernel(%arg0: i32, %arg1: memref<1x8x96xbf16, #tpu.memory_space<vmem>>, %arg2: memref<1x1x8xf32, #tpu.memory_space<vmem>>, %arg3: memref<1x8x32xbf16, #tpu.memory_space<vmem>>) attributes {dimension_semantics = [#tpu.dimension_semantics<parallel>], iteration_bounds = array<i64: 2>, scalar_prefetch = 0 : i64, scratch_operands = 0 : i64, tpu.core_type = #tpu.core_type<tc>, window_params = [{transform_indices = @transform_0, window_bounds = array<i64: 1, 8, 96>}, {transform_indices = @transform_1, window_bounds = array<i64: 1, 1, 8>}, {transform_indices = @transform_2, window_bounds = array<i64: 1, 8, 32>}]} {
    %c0 = arith.constant 0 : index
    %c0_0 = arith.constant 0 : index
    %c0_1 = arith.constant 0 : index
    %0 = vector.load %arg1[%c0, %c0_0, %c0_1] : memref<1x8x96xbf16, #tpu.memory_space<vmem>>, vector<1x8x96xbf16>
    %1 = vector.shape_cast %0 : vector<1x8x96xbf16> to vector<8x96xbf16>
    %c0_2 = arith.constant 0 : index
    %c0_3 = arith.constant 0 : index
    %c0_4 = arith.constant 0 : index
    %2 = vector.load %arg2[%c0_2, %c0_3, %c0_4] : memref<1x1x8xf32, #tpu.memory_space<vmem>>, vector<1x1x8xf32>
    %3 = vector.shape_cast %2 : vector<1x1x8xf32> to vector<1x8xf32>
    %4 = vector.extract_strided_slice %1 {offsets = [0, 0], sizes = [8, 16], strides = [1, 1]} : vector<8x96xbf16> to vector<8x16xbf16>
    %cst = arith.constant 2.500000e-01 : bf16
    %5 = vector.broadcast %cst : bf16 to vector<8x16xbf16>
    %6 = arith.mulf %4, %5 : vector<8x16xbf16>
    %7 = vector.extract_strided_slice %1 {offsets = [0, 32], sizes = [8, 16], strides = [1, 1]} : vector<8x96xbf16> to vector<8x16xbf16>
    %8 = vector.extract_strided_slice %1 {offsets = [0, 64], sizes = [8, 16], strides = [1, 1]} : vector<8x96xbf16> to vector<8x16xbf16>
    %9 = tpu.transpose %7, [1, 0] : vector<8x16xbf16> -> vector<16x8xbf16>
    %cst_5 = arith.constant dense<0.000000e+00> : vector<8x8xf32>
    %10 = tpu.matmul %6, %9, %cst_5 {dimension_numbers = #tpu.dot_dimension_numbers<[1], [0], [0], [1], [0, 0, 1, 1], [], []>} : vector<8x16xbf16>, vector<16x8xbf16>, vector<8x8xf32> -> vector<8x8xf32>
    %11 = vector.broadcast %3 : vector<1x8xf32> to vector<8x8xf32>
    %12 = arith.addf %10, %11 : vector<8x8xf32>
    %cst_6 = arith.constant dense<0xFF800000> : vector<8xf32>
    %13 = vector.multi_reduction <maximumf>, %12, %cst_6 [1] : vector<8x8xf32> to vector<8xf32>
    %14 = vector.shape_cast %13 : vector<8xf32> to vector<8x1xf32>
    %15 = vector.broadcast %14 : vector<8x1xf32> to vector<8x8xf32>
    %16 = arith.subf %12, %15 : vector<8x8xf32>
    %17 = math.exp %16 : vector<8x8xf32>
    %cst_7 = arith.constant dense<0.000000e+00> : vector<8xf32>
    %18 = vector.multi_reduction <add>, %17, %cst_7 [1] : vector<8x8xf32> to vector<8xf32>
    %19 = vector.shape_cast %18 : vector<8xf32> to vector<8x1xf32>
    %20 = tpu.reciprocal %19 {approx = true} : vector<8x1xf32> -> vector<8x1xf32>
    %21 = vector.broadcast %20 : vector<8x1xf32> to vector<8x8xf32>
    %22 = arith.mulf %17, %21 : vector<8x8xf32>
    %23 = arith.truncf %22 : vector<8x8xf32> to vector<8x8xbf16>
    %cst_8 = arith.constant dense<0.000000e+00> : vector<8x16xf32>
    %24 = tpu.matmul %23, %8, %cst_8 {dimension_numbers = #tpu.dot_dimension_numbers<[1], [0], [0], [1], [0, 0, 1, 1], [], []>} : vector<8x8xbf16>, vector<8x16xbf16>, vector<8x16xf32> -> vector<8x16xf32>
    %25 = vector.extract_strided_slice %1 {offsets = [0, 16], sizes = [8, 16], strides = [1, 1]} : vector<8x96xbf16> to vector<8x16xbf16>
    %cst_9 = arith.constant 2.500000e-01 : bf16
    %26 = vector.broadcast %cst_9 : bf16 to vector<8x16xbf16>
    %27 = arith.mulf %25, %26 : vector<8x16xbf16>
    %28 = vector.extract_strided_slice %1 {offsets = [0, 48], sizes = [8, 16], strides = [1, 1]} : vector<8x96xbf16> to vector<8x16xbf16>
    %29 = vector.extract_strided_slice %1 {offsets = [0, 80], sizes = [8, 16], strides = [1, 1]} : vector<8x96xbf16> to vector<8x16xbf16>
    %30 = tpu.transpose %28, [1, 0] : vector<8x16xbf16> -> vector<16x8xbf16>
    %cst_10 = arith.constant dense<0.000000e+00> : vector<8x8xf32>
    %31 = tpu.matmul %27, %30, %cst_10 {dimension_numbers = #tpu.dot_dimension_numbers<[1], [0], [0], [1], [0, 0, 1, 1], [], []>} : vector<8x16xbf16>, vector<16x8xbf16>, vector<8x8xf32> -> vector<8x8xf32>
    %32 = vector.broadcast %3 : vector<1x8xf32> to vector<8x8xf32>
    %33 = arith.addf %31, %32 : vector<8x8xf32>
    %cst_11 = arith.constant dense<0xFF800000> : vector<8xf32>
    %34 = vector.multi_reduction <maximumf>, %33, %cst_11 [1] : vector<8x8xf32> to vector<8xf32>
    %35 = vector.shape_cast %34 : vector<8xf32> to vector<8x1xf32>
    %36 = vector.broadcast %35 : vector<8x1xf32> to vector<8x8xf32>
    %37 = arith.subf %33, %36 : vector<8x8xf32>
    %38 = math.exp %37 : vector<8x8xf32>
    %cst_12 = arith.constant dense<0.000000e+00> : vector<8xf32>
    %39 = vector.multi_reduction <add>, %38, %cst_12 [1] : vector<8x8xf32> to vector<8xf32>
    %40 = vector.shape_cast %39 : vector<8xf32> to vector<8x1xf32>
    %41 = tpu.reciprocal %40 {approx = true} : vector<8x1xf32> -> vector<8x1xf32>
    %42 = vector.broadcast %41 : vector<8x1xf32> to vector<8x8xf32>
    %43 = arith.mulf %38, %42 : vector<8x8xf32>
    %44 = arith.truncf %43 : vector<8x8xf32> to vector<8x8xbf16>
    %cst_13 = arith.constant dense<0.000000e+00> : vector<8x16xf32>
    %45 = tpu.matmul %44, %29, %cst_13 {dimension_numbers = #tpu.dot_dimension_numbers<[1], [0], [0], [1], [0, 0, 1, 1], [], []>} : vector<8x8xbf16>, vector<8x16xbf16>, vector<8x16xf32> -> vector<8x16xf32>
    %46 = tpu.concatenate %24, %45 in 1 : vector<8x16xf32>, vector<8x16xf32> -> vector<8x32xf32>
    %47 = arith.truncf %46 : vector<8x32xf32> to vector<8x32xbf16>
    %c0_14 = arith.constant 0 : index
    %c0_15 = arith.constant 0 : index
    %c0_16 = arith.constant 0 : index
    %48 = vector.load %arg3[%c0_14, %c0_15, %c0_16] : memref<1x8x32xbf16, #tpu.memory_space<vmem>>, vector<1x8x32xbf16>
    %49 = vector.shape_cast %48 : vector<1x8x32xbf16> to vector<8x32xbf16>
    %50 = vector.shape_cast %47 : vector<8x32xbf16> to vector<1x8x32xbf16>
    tpu.vector_store %arg3[%c0_14, %c0_15, %c0_16], %50 {strides = array<i32>} : memref<1x8x32xbf16, #tpu.memory_space<vmem>>, vector<1x8x32xbf16>,
    return
  }
  func.func @transform_0(%arg0: i32) -> (i32, i32, i32) {
    %c0_i32 = arith.constant 0 : i32
    %c0_i32_0 = arith.constant 0 : i32
    %c0_i32_1 = arith.constant 0 : i32
    return %arg0, %c0_i32, %c0_i32_0 : i32, i32, i32
  }
  func.func @transform_1(%arg0: i32) -> (i32, i32, i32) {
    %c0_i32 = arith.constant 0 : i32
    %c0_i32_0 = arith.constant 0 : i32
    %c0_i32_1 = arith.constant 0 : i32
    return %arg0, %c0_i32, %c0_i32_0 : i32, i32, i32
  }
  func.func @transform_2(%arg0: i32) -> (i32, i32, i32) {
    %c0_i32 = arith.constant 0 : i32
    %c0_i32_0 = arith.constant 0 : i32
    %c0_i32_1 = arith.constant 0 : i32
    return %arg0, %c0_i32, %c0_i32_0 : i32, i32, i32
  }
}

module attributes {stable_mosaic.version = 11 : i64} {
  func.func @_linear_add_ln_kernel(%arg0: i32, %arg1: i32, %arg2: memref<16x32xbf16, #tpu.memory_space<vmem>>, %arg3: memref<32x32xbf16, #tpu.memory_space<vmem>>, %arg4: memref<1x32xf32, #tpu.memory_space<vmem>>, %arg5: memref<16x32xbf16, #tpu.memory_space<vmem>>, %arg6: memref<1x32xf32, #tpu.memory_space<vmem>>, %arg7: memref<1x32xf32, #tpu.memory_space<vmem>>, %arg8: memref<16x32xbf16, #tpu.memory_space<vmem>>, %arg9: memref<16x32xf32, #tpu.memory_space<vmem>>) attributes {dimension_semantics = [#tpu.dimension_semantics<parallel>, #tpu.dimension_semantics<arbitrary>], iteration_bounds = array<i64: 1, 1>, scalar_prefetch = 0 : i64, scratch_operands = 1 : i64, tpu.core_type = #tpu.core_type<tc>, window_params = [{transform_indices = @transform_0, window_bounds = array<i64: 16, 32>}, {transform_indices = @transform_1, window_bounds = array<i64: 32, 32>}, {pipeline_mode = #tpu.pipeline_mode<synchronous>, transform_indices = @transform_2, window_bounds = array<i64: 1, 32>}, {transform_indices = @transform_3, window_bounds = array<i64: 16, 32>}, {pipeline_mode = #tpu.pipeline_mode<synchronous>, transform_indices = @transform_4, window_bounds = array<i64: 1, 32>}, {pipeline_mode = #tpu.pipeline_mode<synchronous>, transform_indices = @transform_5, window_bounds = array<i64: 1, 32>}, {transform_indices = @transform_6, window_bounds = array<i64: 16, 32>}]} {
    %c0_i32 = arith.constant 0 : i32
    %0 = arith.cmpi eq, %arg1, %c0_i32 : i32
    %1 = arith.extui %0 : i1 to i32
    %c0_i32_0 = arith.constant 0 : i32
    %2 = arith.cmpi ne, %1, %c0_i32_0 : i32
    scf.if %2 {
      %cst_10 = arith.constant 0.000000e+00 : f32
      %12 = vector.broadcast %cst_10 : f32 to vector<16x32xf32>
      %c0_11 = arith.constant 0 : index
      %c0_12 = arith.constant 0 : index
      %13 = vector.load %arg9[%c0_11, %c0_12] : memref<16x32xf32, #tpu.memory_space<vmem>>, vector<16x32xf32>
      tpu.vector_store %arg9[%c0_11, %c0_12], %12 {strides = array<i32>} : memref<16x32xf32, #tpu.memory_space<vmem>>, vector<16x32xf32>,
    } else {
    }
    %c0 = arith.constant 0 : index
    %c0_1 = arith.constant 0 : index
    %3 = vector.load %arg9[%c0, %c0_1] : memref<16x32xf32, #tpu.memory_space<vmem>>, vector<16x32xf32>
    %c0_2 = arith.constant 0 : index
    %c0_3 = arith.constant 0 : index
    %4 = vector.load %arg2[%c0_2, %c0_3] : memref<16x32xbf16, #tpu.memory_space<vmem>>, vector<16x32xbf16>
    %c0_4 = arith.constant 0 : index
    %c0_5 = arith.constant 0 : index
    %5 = vector.load %arg3[%c0_4, %c0_5] : memref<32x32xbf16, #tpu.memory_space<vmem>>, vector<32x32xbf16>
    %cst = arith.constant dense<0.000000e+00> : vector<16x32xf32>
    %6 = tpu.matmul %4, %5, %cst {dimension_numbers = #tpu.dot_dimension_numbers<[1], [0], [0], [1], [0, 0, 1, 1], [], []>} : vector<16x32xbf16>, vector<32x32xbf16>, vector<16x32xf32> -> vector<16x32xf32>
    %7 = arith.addf %3, %6 : vector<16x32xf32>
    %c0_6 = arith.constant 0 : index
    %c0_7 = arith.constant 0 : index
    %8 = vector.load %arg9[%c0_6, %c0_7] : memref<16x32xf32, #tpu.memory_space<vmem>>, vector<16x32xf32>
    tpu.vector_store %arg9[%c0_6, %c0_7], %7 {strides = array<i32>} : memref<16x32xf32, #tpu.memory_space<vmem>>, vector<16x32xf32>,
    %c0_i32_8 = arith.constant 0 : i32
    %9 = arith.cmpi eq, %arg1, %c0_i32_8 : i32
    %10 = arith.extui %9 : i1 to i32
    %c0_i32_9 = arith.constant 0 : i32
    %11 = arith.cmpi ne, %10, %c0_i32_9 : i32
    scf.if %11 {
      %c0_10 = arith.constant 0 : index
      %c0_11 = arith.constant 0 : index
      %12 = vector.load %arg9[%c0_10, %c0_11] : memref<16x32xf32, #tpu.memory_space<vmem>>, vector<16x32xf32>
      %c0_12 = arith.constant 0 : index
      %c0_13 = arith.constant 0 : index
      %13 = vector.load %arg4[%c0_12, %c0_13] : memref<1x32xf32, #tpu.memory_space<vmem>>, vector<1x32xf32>
      %14 = vector.broadcast %13 : vector<1x32xf32> to vector<16x32xf32>
      %15 = arith.addf %12, %14 : vector<16x32xf32>
      %c0_14 = arith.constant 0 : index
      %c0_15 = arith.constant 0 : index
      %16 = vector.load %arg5[%c0_14, %c0_15] : memref<16x32xbf16, #tpu.memory_space<vmem>>, vector<16x32xbf16>
      %17 = arith.extf %16 : vector<16x32xbf16> to vector<16x32xf32>
      %18 = arith.addf %15, %17 : vector<16x32xf32>
      %cst_16 = arith.constant dense<0.000000e+00> : vector<16xf32>
      %19 = vector.multi_reduction <add>, %18, %cst_16 [1] : vector<16x32xf32> to vector<16xf32>
      %20 = vector.shape_cast %19 : vector<16xf32> to vector<16x1xf32>
      %cst_17 = arith.constant 3.200000e+01 : f32
      %21 = vector.broadcast %cst_17 : f32 to vector<16x1xf32>
      %22 = arith.divf %20, %21 : vector<16x1xf32>
      %23 = vector.broadcast %22 : vector<16x1xf32> to vector<16x32xf32>
      %24 = arith.subf %18, %23 : vector<16x32xf32>
      %25 = vector.broadcast %22 : vector<16x1xf32> to vector<16x32xf32>
      %26 = arith.subf %18, %25 : vector<16x32xf32>
      %27 = arith.mulf %24, %26 : vector<16x32xf32>
      %cst_18 = arith.constant dense<0.000000e+00> : vector<16xf32>
      %28 = vector.multi_reduction <add>, %27, %cst_18 [1] : vector<16x32xf32> to vector<16xf32>
      %29 = vector.shape_cast %28 : vector<16xf32> to vector<16x1xf32>
      %cst_19 = arith.constant 3.200000e+01 : f32
      %30 = vector.broadcast %cst_19 : f32 to vector<16x1xf32>
      %31 = arith.divf %29, %30 : vector<16x1xf32>
      %32 = vector.broadcast %22 : vector<16x1xf32> to vector<16x32xf32>
      %33 = arith.subf %18, %32 : vector<16x32xf32>
      %cst_20 = arith.constant 9.99999996E-13 : f32
      %34 = vector.broadcast %cst_20 : f32 to vector<16x1xf32>
      %35 = arith.addf %31, %34 : vector<16x1xf32>
      %36 = math.rsqrt %35 : vector<16x1xf32>
      %37 = vector.broadcast %36 : vector<16x1xf32> to vector<16x32xf32>
      %38 = arith.mulf %33, %37 : vector<16x32xf32>
      %c0_21 = arith.constant 0 : index
      %c0_22 = arith.constant 0 : index
      %39 = vector.load %arg6[%c0_21, %c0_22] : memref<1x32xf32, #tpu.memory_space<vmem>>, vector<1x32xf32>
      %40 = vector.broadcast %39 : vector<1x32xf32> to vector<16x32xf32>
      %41 = arith.mulf %38, %40 : vector<16x32xf32>
      %c0_23 = arith.constant 0 : index
      %c0_24 = arith.constant 0 : index
      %42 = vector.load %arg7[%c0_23, %c0_24] : memref<1x32xf32, #tpu.memory_space<vmem>>, vector<1x32xf32>
      %43 = vector.broadcast %42 : vector<1x32xf32> to vector<16x32xf32>
      %44 = arith.addf %41, %43 : vector<16x32xf32>
      %45 = arith.truncf %44 : vector<16x32xf32> to vector<16x32xbf16>
      %c0_25 = arith.constant 0 : index
      %c0_26 = arith.constant 0 : index
      %46 = vector.load %arg8[%c0_25, %c0_26] : memref<16x32xbf16, #tpu.memory_space<vmem>>, vector<16x32xbf16>
      tpu.vector_store %arg8[%c0_25, %c0_26], %45 {strides = array<i32>} : memref<16x32xbf16, #tpu.memory_space<vmem>>, vector<16x32xbf16>,
    } else {
    }
    return
  }
  func.func @transform_0(%arg0: i32, %arg1: i32) -> (i32, i32) {
    %c0_i32 = arith.constant 0 : i32
    return %arg0, %arg1 : i32, i32
  }
  func.func @transform_1(%arg0: i32, %arg1: i32) -> (i32, i32) {
    %c0_i32 = arith.constant 0 : i32
    %c0_i32_0 = arith.constant 0 : i32
    return %arg1, %c0_i32 : i32, i32
  }
  func.func @transform_2(%arg0: i32, %arg1: i32) -> (i32, i32) {
    %c0_i32 = arith.constant 0 : i32
    %c0_i32_0 = arith.constant 0 : i32
    %c0_i32_1 = arith.constant 0 : i32
    return %c0_i32, %c0_i32_0 : i32, i32
  }
  func.func @transform_3(%arg0: i32, %arg1: i32) -> (i32, i32) {
    %c0_i32 = arith.constant 0 : i32
    %c0_i32_0 = arith.constant 0 : i32
    return %arg0, %c0_i32 : i32, i32
  }
  func.func @transform_4(%arg0: i32, %arg1: i32) -> (i32, i32) {
    %c0_i32 = arith.constant 0 : i32
    %c0_i32_0 = arith.constant 0 : i32
    %c0_i32_1 = arith.constant 0 : i32
    return %c0_i32, %c0_i32_0 : i32, i32
  }
  func.func @transform_5(%arg0: i32, %arg1: i32) -> (i32, i32) {
    %c0_i32 = arith.constant 0 : i32
    %c0_i32_0 = arith.constant 0 : i32
    %c0_i32_1 = arith.constant 0 : i32
    return %c0_i32, %c0_i32_0 : i32, i32
  }
  func.func @transform_6(%arg0: i32, %arg1: i32) -> (i32, i32) {
    %c0_i32 = arith.constant 0 : i32
    %c0_i32_0 = arith.constant 0 : i32
    return %arg0, %c0_i32 : i32, i32
  }
}

module attributes {stable_mosaic.version = 11 : i64} {
  func.func @_linear_kernel(%arg0: i32, %arg1: i32, %arg2: i32, %arg3: memref<16x32xbf16, #tpu.memory_space<vmem>>, %arg4: memref<32x64xbf16, #tpu.memory_space<vmem>>, %arg5: memref<1x64xf32, #tpu.memory_space<vmem>>, %arg6: memref<16x64xbf16, #tpu.memory_space<vmem>>, %arg7: memref<16x64xf32, #tpu.memory_space<vmem>>) attributes {dimension_semantics = [#tpu.dimension_semantics<parallel>, #tpu.dimension_semantics<parallel>, #tpu.dimension_semantics<arbitrary>], iteration_bounds = array<i64: 1, 1, 1>, scalar_prefetch = 0 : i64, scratch_operands = 1 : i64, tpu.core_type = #tpu.core_type<tc>, window_params = [{transform_indices = @transform_0, window_bounds = array<i64: 16, 32>}, {transform_indices = @transform_1, window_bounds = array<i64: 32, 64>}, {transform_indices = @transform_2, window_bounds = array<i64: 1, 64>}, {transform_indices = @transform_3, window_bounds = array<i64: 16, 64>}]} {
    %c0_i32 = arith.constant 0 : i32
    %0 = arith.cmpi eq, %arg2, %c0_i32 : i32
    %1 = arith.extui %0 : i1 to i32
    %c0_i32_0 = arith.constant 0 : i32
    %2 = arith.cmpi ne, %1, %c0_i32_0 : i32
    scf.if %2 {
      %cst_10 = arith.constant 0.000000e+00 : f32
      %12 = vector.broadcast %cst_10 : f32 to vector<16x64xf32>
      %c0_11 = arith.constant 0 : index
      %c0_12 = arith.constant 0 : index
      %13 = vector.load %arg7[%c0_11, %c0_12] : memref<16x64xf32, #tpu.memory_space<vmem>>, vector<16x64xf32>
      tpu.vector_store %arg7[%c0_11, %c0_12], %12 {strides = array<i32>} : memref<16x64xf32, #tpu.memory_space<vmem>>, vector<16x64xf32>,
    } else {
    }
    %c0 = arith.constant 0 : index
    %c0_1 = arith.constant 0 : index
    %3 = vector.load %arg7[%c0, %c0_1] : memref<16x64xf32, #tpu.memory_space<vmem>>, vector<16x64xf32>
    %c0_2 = arith.constant 0 : index
    %c0_3 = arith.constant 0 : index
    %4 = vector.load %arg3[%c0_2, %c0_3] : memref<16x32xbf16, #tpu.memory_space<vmem>>, vector<16x32xbf16>
    %c0_4 = arith.constant 0 : index
    %c0_5 = arith.constant 0 : index
    %5 = vector.load %arg4[%c0_4, %c0_5] : memref<32x64xbf16, #tpu.memory_space<vmem>>, vector<32x64xbf16>
    %cst = arith.constant dense<0.000000e+00> : vector<16x64xf32>
    %6 = tpu.matmul %4, %5, %cst {dimension_numbers = #tpu.dot_dimension_numbers<[1], [0], [0], [1], [0, 0, 1, 1], [], []>} : vector<16x32xbf16>, vector<32x64xbf16>, vector<16x64xf32> -> vector<16x64xf32>
    %7 = arith.addf %3, %6 : vector<16x64xf32>
    %c0_6 = arith.constant 0 : index
    %c0_7 = arith.constant 0 : index
    %8 = vector.load %arg7[%c0_6, %c0_7] : memref<16x64xf32, #tpu.memory_space<vmem>>, vector<16x64xf32>
    tpu.vector_store %arg7[%c0_6, %c0_7], %7 {strides = array<i32>} : memref<16x64xf32, #tpu.memory_space<vmem>>, vector<16x64xf32>,
    %c0_i32_8 = arith.constant 0 : i32
    %9 = arith.cmpi eq, %arg2, %c0_i32_8 : i32
    %10 = arith.extui %9 : i1 to i32
    %c0_i32_9 = arith.constant 0 : i32
    %11 = arith.cmpi ne, %10, %c0_i32_9 : i32
    scf.if %11 {
      %c0_10 = arith.constant 0 : index
      %c0_11 = arith.constant 0 : index
      %12 = vector.load %arg7[%c0_10, %c0_11] : memref<16x64xf32, #tpu.memory_space<vmem>>, vector<16x64xf32>
      %c0_12 = arith.constant 0 : index
      %c0_13 = arith.constant 0 : index
      %13 = vector.load %arg5[%c0_12, %c0_13] : memref<1x64xf32, #tpu.memory_space<vmem>>, vector<1x64xf32>
      %14 = vector.broadcast %13 : vector<1x64xf32> to vector<16x64xf32>
      %15 = arith.addf %12, %14 : vector<16x64xf32>
      %cst_14 = arith.constant 5.000000e-01 : f32
      %16 = vector.broadcast %cst_14 : f32 to vector<16x64xf32>
      %17 = arith.mulf %16, %15 : vector<16x64xf32>
      %cst_15 = arith.constant 4.471500e-02 : f32
      %18 = vector.broadcast %cst_15 : f32 to vector<16x64xf32>
      %19 = arith.mulf %18, %15 : vector<16x64xf32>
      %20 = arith.mulf %19, %15 : vector<16x64xf32>
      %21 = arith.mulf %20, %15 : vector<16x64xf32>
      %22 = arith.addf %15, %21 : vector<16x64xf32>
      %cst_16 = arith.constant 0.797884583 : f32
      %23 = vector.broadcast %cst_16 : f32 to vector<16x64xf32>
      %24 = arith.mulf %23, %22 : vector<16x64xf32>
      %25 = math.tanh %24 : vector<16x64xf32>
      %cst_17 = arith.constant 1.000000e+00 : f32
      %26 = vector.broadcast %cst_17 : f32 to vector<16x64xf32>
      %27 = arith.addf %26, %25 : vector<16x64xf32>
      %28 = arith.mulf %17, %27 : vector<16x64xf32>
      %29 = arith.truncf %28 : vector<16x64xf32> to vector<16x64xbf16>
      %c0_18 = arith.constant 0 : index
      %c0_19 = arith.constant 0 : index
      %30 = vector.load %arg6[%c0_18, %c0_19] : memref<16x64xbf16, #tpu.memory_space<vmem>>, vector<16x64xbf16>
      tpu.vector_store %arg6[%c0_18, %c0_19], %29 {strides = array<i32>} : memref<16x64xbf16, #tpu.memory_space<vmem>>, vector<16x64xbf16>,
    } else {
    }
    return
  }
  func.func @transform_0(%arg0: i32, %arg1: i32, %arg2: i32) -> (i32, i32) {
    %c0_i32 = arith.constant 0 : i32
    return %arg0, %arg2 : i32, i32
  }
  func.func @transform_1(%arg0: i32, %arg1: i32, %arg2: i32) -> (i32, i32) {
    %c0_i32 = arith.constant 0 : i32
    return %arg2, %arg1 : i32, i32
  }
  func.func @transform_2(%arg0: i32, %arg1: i32, %arg2: i32) -> (i32, i32) {
    %c0_i32 = arith.constant 0 : i32
    %c0_i32_0 = arith.constant 0 : i32
    return %c0_i32, %arg1 : i32, i32
  }
  func.func @transform_3(%arg0: i32, %arg1: i32, %arg2: i32) -> (i32, i32) {
    %c0_i32 = arith.constant 0 : i32
    return %arg0, %arg1 : i32, i32
  }
}

module attributes {stable_mosaic.version = 11 : i64} {
  func.func @_linear_add_ln_kernel(%arg0: i32, %arg1: i32, %arg2: memref<16x64xbf16, #tpu.memory_space<vmem>>, %arg3: memref<64x32xbf16, #tpu.memory_space<vmem>>, %arg4: memref<1x32xf32, #tpu.memory_space<vmem>>, %arg5: memref<16x32xbf16, #tpu.memory_space<vmem>>, %arg6: memref<1x32xf32, #tpu.memory_space<vmem>>, %arg7: memref<1x32xf32, #tpu.memory_space<vmem>>, %arg8: memref<16x32xbf16, #tpu.memory_space<vmem>>, %arg9: memref<16x32xf32, #tpu.memory_space<vmem>>) attributes {dimension_semantics = [#tpu.dimension_semantics<parallel>, #tpu.dimension_semantics<arbitrary>], iteration_bounds = array<i64: 1, 1>, scalar_prefetch = 0 : i64, scratch_operands = 1 : i64, tpu.core_type = #tpu.core_type<tc>, window_params = [{transform_indices = @transform_0, window_bounds = array<i64: 16, 64>}, {transform_indices = @transform_1, window_bounds = array<i64: 64, 32>}, {pipeline_mode = #tpu.pipeline_mode<synchronous>, transform_indices = @transform_2, window_bounds = array<i64: 1, 32>}, {transform_indices = @transform_3, window_bounds = array<i64: 16, 32>}, {pipeline_mode = #tpu.pipeline_mode<synchronous>, transform_indices = @transform_4, window_bounds = array<i64: 1, 32>}, {pipeline_mode = #tpu.pipeline_mode<synchronous>, transform_indices = @transform_5, window_bounds = array<i64: 1, 32>}, {transform_indices = @transform_6, window_bounds = array<i64: 16, 32>}]} {
    %c0_i32 = arith.constant 0 : i32
    %0 = arith.cmpi eq, %arg1, %c0_i32 : i32
    %1 = arith.extui %0 : i1 to i32
    %c0_i32_0 = arith.constant 0 : i32
    %2 = arith.cmpi ne, %1, %c0_i32_0 : i32
    scf.if %2 {
      %cst_10 = arith.constant 0.000000e+00 : f32
      %12 = vector.broadcast %cst_10 : f32 to vector<16x32xf32>
      %c0_11 = arith.constant 0 : index
      %c0_12 = arith.constant 0 : index
      %13 = vector.load %arg9[%c0_11, %c0_12] : memref<16x32xf32, #tpu.memory_space<vmem>>, vector<16x32xf32>
      tpu.vector_store %arg9[%c0_11, %c0_12], %12 {strides = array<i32>} : memref<16x32xf32, #tpu.memory_space<vmem>>, vector<16x32xf32>,
    } else {
    }
    %c0 = arith.constant 0 : index
    %c0_1 = arith.constant 0 : index
    %3 = vector.load %arg9[%c0, %c0_1] : memref<16x32xf32, #tpu.memory_space<vmem>>, vector<16x32xf32>
    %c0_2 = arith.constant 0 : index
    %c0_3 = arith.constant 0 : index
    %4 = vector.load %arg2[%c0_2, %c0_3] : memref<16x64xbf16, #tpu.memory_space<vmem>>, vector<16x64xbf16>
    %c0_4 = arith.constant 0 : index
    %c0_5 = arith.constant 0 : index
    %5 = vector.load %arg3[%c0_4, %c0_5] : memref<64x32xbf16, #tpu.memory_space<vmem>>, vector<64x32xbf16>
    %cst = arith.constant dense<0.000000e+00> : vector<16x32xf32>
    %6 = tpu.matmul %4, %5, %cst {dimension_numbers = #tpu.dot_dimension_numbers<[1], [0], [0], [1], [0, 0, 1, 1], [], []>} : vector<16x64xbf16>, vector<64x32xbf16>, vector<16x32xf32> -> vector<16x32xf32>
    %7 = arith.addf %3, %6 : vector<16x32xf32>
    %c0_6 = arith.constant 0 : index
    %c0_7 = arith.constant 0 : index
    %8 = vector.load %arg9[%c0_6, %c0_7] : memref<16x32xf32, #tpu.memory_space<vmem>>, vector<16x32xf32>
    tpu.vector_store %arg9[%c0_6, %c0_7], %7 {strides = array<i32>} : memref<16x32xf32, #tpu.memory_space<vmem>>, vector<16x32xf32>,
    %c0_i32_8 = arith.constant 0 : i32
    %9 = arith.cmpi eq, %arg1, %c0_i32_8 : i32
    %10 = arith.extui %9 : i1 to i32
    %c0_i32_9 = arith.constant 0 : i32
    %11 = arith.cmpi ne, %10, %c0_i32_9 : i32
    scf.if %11 {
      %c0_10 = arith.constant 0 : index
      %c0_11 = arith.constant 0 : index
      %12 = vector.load %arg9[%c0_10, %c0_11] : memref<16x32xf32, #tpu.memory_space<vmem>>, vector<16x32xf32>
      %c0_12 = arith.constant 0 : index
      %c0_13 = arith.constant 0 : index
      %13 = vector.load %arg4[%c0_12, %c0_13] : memref<1x32xf32, #tpu.memory_space<vmem>>, vector<1x32xf32>
      %14 = vector.broadcast %13 : vector<1x32xf32> to vector<16x32xf32>
      %15 = arith.addf %12, %14 : vector<16x32xf32>
      %c0_14 = arith.constant 0 : index
      %c0_15 = arith.constant 0 : index
      %16 = vector.load %arg5[%c0_14, %c0_15] : memref<16x32xbf16, #tpu.memory_space<vmem>>, vector<16x32xbf16>
      %17 = arith.extf %16 : vector<16x32xbf16> to vector<16x32xf32>
      %18 = arith.addf %15, %17 : vector<16x32xf32>
      %cst_16 = arith.constant dense<0.000000e+00> : vector<16xf32>
      %19 = vector.multi_reduction <add>, %18, %cst_16 [1] : vector<16x32xf32> to vector<16xf32>
      %20 = vector.shape_cast %19 : vector<16xf32> to vector<16x1xf32>
      %cst_17 = arith.constant 3.200000e+01 : f32
      %21 = vector.broadcast %cst_17 : f32 to vector<16x1xf32>
      %22 = arith.divf %20, %21 : vector<16x1xf32>
      %23 = vector.broadcast %22 : vector<16x1xf32> to vector<16x32xf32>
      %24 = arith.subf %18, %23 : vector<16x32xf32>
      %25 = vector.broadcast %22 : vector<16x1xf32> to vector<16x32xf32>
      %26 = arith.subf %18, %25 : vector<16x32xf32>
      %27 = arith.mulf %24, %26 : vector<16x32xf32>
      %cst_18 = arith.constant dense<0.000000e+00> : vector<16xf32>
      %28 = vector.multi_reduction <add>, %27, %cst_18 [1] : vector<16x32xf32> to vector<16xf32>
      %29 = vector.shape_cast %28 : vector<16xf32> to vector<16x1xf32>
      %cst_19 = arith.constant 3.200000e+01 : f32
      %30 = vector.broadcast %cst_19 : f32 to vector<16x1xf32>
      %31 = arith.divf %29, %30 : vector<16x1xf32>
      %32 = vector.broadcast %22 : vector<16x1xf32> to vector<16x32xf32>
      %33 = arith.subf %18, %32 : vector<16x32xf32>
      %cst_20 = arith.constant 9.99999996E-13 : f32
      %34 = vector.broadcast %cst_20 : f32 to vector<16x1xf32>
      %35 = arith.addf %31, %34 : vector<16x1xf32>
      %36 = math.rsqrt %35 : vector<16x1xf32>
      %37 = vector.broadcast %36 : vector<16x1xf32> to vector<16x32xf32>
      %38 = arith.mulf %33, %37 : vector<16x32xf32>
      %c0_21 = arith.constant 0 : index
      %c0_22 = arith.constant 0 : index
      %39 = vector.load %arg6[%c0_21, %c0_22] : memref<1x32xf32, #tpu.memory_space<vmem>>, vector<1x32xf32>
      %40 = vector.broadcast %39 : vector<1x32xf32> to vector<16x32xf32>
      %41 = arith.mulf %38, %40 : vector<16x32xf32>
      %c0_23 = arith.constant 0 : index
      %c0_24 = arith.constant 0 : index
      %42 = vector.load %arg7[%c0_23, %c0_24] : memref<1x32xf32, #tpu.memory_space<vmem>>, vector<1x32xf32>
      %43 = vector.broadcast %42 : vector<1x32xf32> to vector<16x32xf32>
      %44 = arith.addf %41, %43 : vector<16x32xf32>
      %45 = arith.truncf %44 : vector<16x32xf32> to vector<16x32xbf16>
      %c0_25 = arith.constant 0 : index
      %c0_26 = arith.constant 0 : index
      %46 = vector.load %arg8[%c0_25, %c0_26] : memref<16x32xbf16, #tpu.memory_space<vmem>>, vector<16x32xbf16>
      tpu.vector_store %arg8[%c0_25, %c0_26], %45 {strides = array<i32>} : memref<16x32xbf16, #tpu.memory_space<vmem>>, vector<16x32xbf16>,
    } else {
    }
    return
  }
  func.func @transform_0(%arg0: i32, %arg1: i32) -> (i32, i32) {
    %c0_i32 = arith.constant 0 : i32
    return %arg0, %arg1 : i32, i32
  }
  func.func @transform_1(%arg0: i32, %arg1: i32) -> (i32, i32) {
    %c0_i32 = arith.constant 0 : i32
    %c0_i32_0 = arith.constant 0 : i32
    return %arg1, %c0_i32 : i32, i32
  }
  func.func @transform_2(%arg0: i32, %arg1: i32) -> (i32, i32) {
    %c0_i32 = arith.constant 0 : i32
    %c0_i32_0 = arith.constant 0 : i32
    %c0_i32_1 = arith.constant 0 : i32
    return %c0_i32, %c0_i32_0 : i32, i32
  }
  func.func @transform_3(%arg0: i32, %arg1: i32) -> (i32, i32) {
    %c0_i32 = arith.constant 0 : i32
    %c0_i32_0 = arith.constant 0 : i32
    return %arg0, %c0_i32 : i32, i32
  }
  func.func @transform_4(%arg0: i32, %arg1: i32) -> (i32, i32) {
    %c0_i32 = arith.constant 0 : i32
    %c0_i32_0 = arith.constant 0 : i32
    %c0_i32_1 = arith.constant 0 : i32
    return %c0_i32, %c0_i32_0 : i32, i32
  }
  func.func @transform_5(%arg0: i32, %arg1: i32) -> (i32, i32) {
    %c0_i32 = arith.constant 0 : i32
    %c0_i32_0 = arith.constant 0 : i32
    %c0_i32_1 = arith.constant 0 : i32
    return %c0_i32, %c0_i32_0 : i32, i32
  }
  func.func @transform_6(%arg0: i32, %arg1: i32) -> (i32, i32) {
    %c0_i32 = arith.constant 0 : i32
    %c0_i32_0 = arith.constant 0 : i32
    return %arg0, %c0_i32 : i32, i32
  }
}

module attributes {stable_mosaic.version = 11 : i64} {
  func.func @_pooler_head_kernel(%arg0: memref<2x32xbf16, #tpu.memory_space<vmem>>, %arg1: memref<32x32xbf16, #tpu.memory_space<vmem>>, %arg2: memref<1x32xf32, #tpu.memory_space<vmem>>, %arg3: memref<32x2xbf16, #tpu.memory_space<vmem>>, %arg4: memref<1x2xf32, #tpu.memory_space<vmem>>, %arg5: memref<2x2xf32, #tpu.memory_space<vmem>>) attributes {dimension_semantics = [], scalar_prefetch = 0 : i64, scratch_operands = 0 : i64, tpu.core_type = #tpu.core_type<tc>} {
    %c0 = arith.constant 0 : index
    %c0_0 = arith.constant 0 : index
    %0 = vector.load %arg0[%c0, %c0_0] : memref<2x32xbf16, #tpu.memory_space<vmem>>, vector<2x32xbf16>
    %c0_1 = arith.constant 0 : index
    %c0_2 = arith.constant 0 : index
    %1 = vector.load %arg1[%c0_1, %c0_2] : memref<32x32xbf16, #tpu.memory_space<vmem>>, vector<32x32xbf16>
    %cst = arith.constant dense<0.000000e+00> : vector<2x32xf32>
    %2 = tpu.matmul %0, %1, %cst {dimension_numbers = #tpu.dot_dimension_numbers<[1], [0], [0], [1], [0, 0, 1, 1], [], []>} : vector<2x32xbf16>, vector<32x32xbf16>, vector<2x32xf32> -> vector<2x32xf32>
    %c0_3 = arith.constant 0 : index
    %c0_4 = arith.constant 0 : index
    %3 = vector.load %arg2[%c0_3, %c0_4] : memref<1x32xf32, #tpu.memory_space<vmem>>, vector<1x32xf32>
    %4 = vector.broadcast %3 : vector<1x32xf32> to vector<2x32xf32>
    %5 = arith.addf %2, %4 : vector<2x32xf32>
    %6 = math.tanh %5 : vector<2x32xf32>
    %7 = arith.truncf %6 : vector<2x32xf32> to vector<2x32xbf16>
    %c0_5 = arith.constant 0 : index
    %c0_6 = arith.constant 0 : index
    %8 = vector.load %arg3[%c0_5, %c0_6] : memref<32x2xbf16, #tpu.memory_space<vmem>>, vector<32x2xbf16>
    %cst_7 = arith.constant dense<0.000000e+00> : vector<2x2xf32>
    %9 = tpu.matmul %7, %8, %cst_7 {dimension_numbers = #tpu.dot_dimension_numbers<[1], [0], [0], [1], [0, 0, 1, 1], [], []>} : vector<2x32xbf16>, vector<32x2xbf16>, vector<2x2xf32> -> vector<2x2xf32>
    %c0_8 = arith.constant 0 : index
    %c0_9 = arith.constant 0 : index
    %10 = vector.load %arg4[%c0_8, %c0_9] : memref<1x2xf32, #tpu.memory_space<vmem>>, vector<1x2xf32>
    %11 = vector.broadcast %10 : vector<1x2xf32> to vector<2x2xf32>
    %12 = arith.addf %9, %11 : vector<2x2xf32>
    %cst_10 = arith.constant 0.000000e+00 : f32
    %13 = vector.broadcast %cst_10 : f32 to vector<2x2xf32>
    %14 = arith.maximumf %12, %13 : vector<2x2xf32>
    %cst_11 = arith.constant dense<0xFF800000> : vector<2xf32>
    %15 = vector.multi_reduction <maximumf>, %14, %cst_11 [1] : vector<2x2xf32> to vector<2xf32>
    %16 = vector.shape_cast %15 : vector<2xf32> to vector<2x1xf32>
    %17 = vector.broadcast %16 : vector<2x1xf32> to vector<2x2xf32>
    %18 = arith.subf %14, %17 : vector<2x2xf32>
    %19 = math.exp %18 : vector<2x2xf32>
    %cst_12 = arith.constant dense<0.000000e+00> : vector<2xf32>
    %20 = vector.multi_reduction <add>, %19, %cst_12 [1] : vector<2x2xf32> to vector<2xf32>
    %21 = vector.shape_cast %20 : vector<2xf32> to vector<2x1xf32>
    %22 = vector.broadcast %21 : vector<2x1xf32> to vector<2x2xf32>
    %23 = arith.divf %19, %22 : vector<2x2xf32>
    %c0_13 = arith.constant 0 : index
    %c0_14 = arith.constant 0 : index
    %24 = vector.load %arg5[%c0_13, %c0_14] : memref<2x2xf32, #tpu.memory_space<vmem>>, vector<2x2xf32>
    tpu.vector_store %arg5[%c0_13, %c0_14], %23 {strides = array<i32>} : memref<2x2xf32, #tpu.memory_space<vmem>>, vector<2x2xf32>,
    return
  }
}

</mosaic_0001>

<bundles_post_ra>
// kernel: bert_with_head_forward.13
= control target key start
LH: loop header
LB: loop body
LE: loop exit
PB: predicated region body
PF: predicated region fallthrough
CT: control target
= control target key end

     0   :  { %vm19_vm0 = vcmask 785408   ;;  %v151_v0 = vmov 0.0   ;;  %vm152_vm1 = vmmov 0   ;;  %vm47_vm2 = vcmask 261120   ;;  %s195_s1 = inlined_call_operand.vmem [shape: bf16[32,96], index: 1, kind: input, shape index: {}]   ;;  %s196_s0 = inlined_call_operand.vmem [shape: bf16[16,32], index: 0, kind: input, shape index: {}]   ;;  %s197_s2 = inlined_call_operand.vmem [shape: f32[1,96], index: 2, kind: input, shape index: {}]   ;;  %s198_s3 = inlined_call_operand.vmem [shape: bf16[16,96], index: 3, kind: output, shape index: {}]  }
   0x1   :  { %138 = vmatprep.subr.bf16.mxu0 %v151_v0  ;;  %v148_v1 = vld [vmem:[%s195_s1] sm:$0xff]   ;;  %142 = vmatprep.mubr.msk.bf16.mxu0 %vm152_vm1, %v151_v0  ;;  %20 = vst.msk [vmem:[#allocation2] sm:$0xff] %vm19_vm0, %v151_v0  ;;  %21 = vst.msk [vmem:[#allocation2 + $0x8] sm:$0xff] %vm19_vm0, %v151_v0  ;;  %v149_v2 = vld [vmem:[%s195_s1 + $0x8] sm:$0xff]   ;;  %vm119_vm3 = vcmask 781312  }
   0x2   :  { %139 = vmatpush3.bf16.msra.mxu0 %v148_v1  ;;  %v150_v3 = vld [vmem:[%s196_s0] sm:$0xff]  }
   0x3   :  { %140 = vmatprep.subr.bf16.mxu0 %v151_v0  ;;  %v130_v12 = vld [vmem:[%s197_s2] ss:$0 sm:$0xff] }
   0x6   :  { %141 = vmatpush3.bf16.msra.mxu0 %v149_v2 }
   0x8   :  { %v22_v4 = vld [vmem:[#allocation2] sm:$0xff]  ;;  %v23_v6 = vld [vmem:[#allocation2 + $0x8] sm:$0xff] }
   0x9   :  { %143 = vmatmul.mubr.msk.bf16.vlgmr.msra.gmra.mrb[0].mxu0 %vm47_vm2, %v150_v3 }
  0xdc   :  { %v85_v5 = vpop.f32.mrb[0].mxu0 }
  0xdd   :  { %v92_v7 = vadd.f32 %v85_v5, %v22_v4  ;;  %v144_v8 = vpop.f32.mrb[1].mxu0 }
  0xde   :  { %v88_v9 = vpop.f32.mrb[2].mxu0 }
  0xdf   :  { %95 = vst.msk [vmem:[#allocation2] sm:$0xff] %vm19_vm0, %v92_v7  ;;  %v93_v10 = vadd.f32 %v88_v9, %v23_v6  ;;  %v145_v11 = vpop.f32.mrb[3].mxu0 }
  0xe1   :  { %96 = vst.msk [vmem:[#allocation2 + $0x8] sm:$0xff] %vm19_vm0, %v93_v10 }
  0xe6   :  { %v100_v13 = vld [vmem:[#allocation2] sm:$0xff] }
  0xe7   :  { %v109_v14 = vadd.f32 %v130_v12, %v100_v13 }
  0xe8   :  { %v101_v15 = vld [vmem:[#allocation2 + $0x8] sm:$0xff] }
  0xe9   :  { %v133_v16 = vpack.c.bf16 %v109_v14, %v109_v14  ;;  %v110_v17 = vadd.f32 %v130_v12, %v101_v15 }
  0xeb   :  { %120 = vst.msk [vmem:[%s198_s3] sm:$0xf] %vm119_vm3, %v133_v16  ;;  %v134_v18 = vpack.c.bf16 %v110_v17, %v110_v17 }
  0xed   :  { %121 = vst.msk [vmem:[%s198_s3 + $0x4] sm:$0xf] %vm119_vm3, %v134_v18 }

// kernel: bert_with_head_forward.12
= control target key start
LH: loop header
LB: loop body
LE: loop exit
PB: predicated region body
PF: predicated region fallthrough
CT: control target
= control target key end

     0   :  { %s401_s18 = smov 0   ;;  %s434_s0 = inlined_call_operand.vmem [shape: f32[2,8,32], index: 0, kind: input, shape index: {}]   ;;  %s435_s1 = inlined_call_operand.vmem [shape: f32[2,8,32], index: 1, kind: input, shape index: {}]   ;;  %s436_s2 = inlined_call_operand.vmem [shape: f32[8,32], index: 2, kind: input, shape index: {}]   ;;  %s437_s3 = inlined_call_operand.vmem [shape: f32[1,32], index: 3, kind: input, shape index: {}]   ;;  %s438_s4 = inlined_call_operand.vmem [shape: f32[1,32], index: 4, kind: input, shape index: {}]   ;;  %s439_s5 = inlined_call_operand.vmem [shape: bf16[2,8,32], index: 5, kind: output, shape index: {}]  }
   0x1 LB: > { %s341_s19 = sadd.s32 4294967295, %s369_s18   ;;  %p345_p0 = scmp.ge.s32.totalorder %s369_s18, 1  ;;  %s369_s18 = sphi %s401_s18, %s15_s18  }
   0x2   : > { %p195_p1 = scmp.lt.s32.totalorder %s369_s18, 3 }
   0x4   : > { %p196_p2 = pnand %p345_p0, %p195_p1 }
   0x5   : > { %p225_p3 = scmp.lt.s32.totalorder (!%p196_p2), %s341_s19, 1  ;;  %v240_v2 = vld [vmem:[%s436_s2] sm:$0xff] (!%p196_p2)  ;;  %vm242_vm0 = vcmask (!%p196_p2), 261120   ;;  %vm274_vm1 = vcmask (!%p196_p2), 257024  }
   0x6   : > { %199 = sbr.rel (%p196_p2) target bundleno = 338 (0x152), region = 40  ;;  %v349_v15 = vld [vmem:[%s437_s3] ss:$0 sm:$0xff] (!%p196_p2) }
   0x7   : > { %v350_v17 = vld [vmem:[%s438_s4] ss:$0 sm:$0xff] (!%p196_p2) }
   0xd   : > { %s441_s19 = smov (!%p225_p3, %s341_s19), 1 }
   0xe   : > { %s346_s20 = sshll.u32 %s441_s19, 3  ;;  %s348_s8 = sshll.u32 %s441_s19, 2 }
   0xf   : > { %s228_s23 = scalar_lea.vmem %s434_s0, %s346_s20  ;;  %s232_s26 = scalar_lea.vmem %s435_s1, %s346_s20 }
  0x10   : > { %v237_v0 = vld [vmem:[%s228_s23] sm:$0xff]  ;;  %s236_s11 = scalar_lea.vmem %s439_s5, %s348_s8 }
  0x11   : > { %v238_v1 = vld [vmem:[%s232_s26] sm:$0xff] }
  0x12   : > { %v239_v3 = vadd.f32 %v238_v1, %v237_v0 }
  0x14   : > { %v241_v4 = vadd.f32 %v240_v2, %v239_v3 }
  0x16   : > { %v243_v5 = vsel %vm242_vm0, %v241_v4, 0.0 }
  0x17   : > { %244 = vadd.xlane.f32.xlu0 %v243_v5 }
  0xa4   : > { %v245_v6 = vpop.xlane.xlu0 %244 }
  0xa5   : > { %v247_v7 = vmul.f32 0.03125, %v245_v6 }
  0xa7   : > { %v248_v8 = vsub.f32 %v241_v4, %v247_v7 }
  0xa9   : > { %v249_v9 = vmul.f32 %v248_v8, %v248_v8 }
  0xab   : > { %v250_v10 = vsel %vm242_vm0, %v249_v9, 0.0 }
  0xac   : > { %251 = vadd.xlane.f32.xlu0 %v250_v10 }
 0x139   : > { %v252_v11 = vpop.xlane.xlu0 %251 }
 0x13a   : > { %v253_v12 = vmul.f32 0.03125, %v252_v11 }
 0x13c   : > { %v254_v13 = vadd.f32 1e-12, %v253_v12 }
 0x13e   : > { %361 = vrsqrt.f32 %v254_v13 }
 0x148   : > { %v362_v14 = vpop.eup %361 }
 0x149   : > { %v256_v16 = vmul.f32 %v362_v14, %v248_v8 }
 0x14b   : > { %v264_v18 = vmul.f32 %v349_v15, %v256_v16 }
 0x14d   : > { %v272_v19 = vadd.f32 %v350_v17, %v264_v18 }
 0x14f   : > { %v273_v20 = vpack.c.bf16 %v272_v19, %v272_v19 }
 0x151   : > { %275 = vst.msk [vmem:[%s236_s11] sm:$0xf] %vm274_vm1, %v273_v20 }
 0x152 PF: > { %s15_s18 = sadd.s32 1, %s369_s18  }
 0x153   : > { %p12_p4 = scmp.ge.s32.totalorder %s15_s18, 4  }
 0x155   :  { %14 = sbr.rel (!%p12_p4) target bundleno = 1 (0x1), region = 73 }

// kernel: bert_with_head_forward.15
= control target key start
LH: loop header
LB: loop body
LE: loop exit
PB: predicated region body
PF: predicated region fallthrough
CT: control target
= control target key end

     0   :  { %vm28_vm0 = vcmask 261120   ;;  %v220_v0 = vmov 0.0   ;;  %vm221_vm1 = vmmov 0   ;;  %vm178_vm2 = vcmask 257024   ;;  %s293_s1 = inlined_call_operand.vmem [shape: bf16[32,32], index: 1, kind: input, shape index: {}]   ;;  %s294_s0 = inlined_call_operand.vmem [shape: bf16[16,32], index: 0, kind: input, shape index: {}]   ;;  %s295_s3 = inlined_call_operand.vmem [shape: bf16[16,32], index: 3, kind: input, shape index: {}]   ;;  %s296_s2 = inlined_call_operand.vmem [shape: f32[1,32], index: 2, kind: input, shape index: {}]   ;;  %s297_s4 = inlined_call_operand.vmem [shape: f32[1,32], index: 4, kind: input, shape index: {}]   ;;  %s298_s5 = inlined_call_operand.vmem [shape: f32[1,32], index: 5, kind: input, shape index: {}]   ;;  %s299_s6 = inlined_call_operand.vmem [shape: bf16[16,32], index: 6, kind: output, shape index: {}]  }
   0x1   :  { %203 = vmatprep.subr.bf16.mxu0 %v220_v0  ;;  %v213_v1 = vld [vmem:[%s293_s1] sm:$0xff]   ;;  %207 = vmatprep.mubr.msk.bf16.mxu0 %vm221_vm1, %v220_v0  ;;  %29 = vst.msk [vmem:[#allocation2] sm:$0xff] %vm28_vm0, %v220_v0  ;;  %30 = vst.msk [vmem:[#allocation2 + $0x8] sm:$0xff] %vm28_vm0, %v220_v0  ;;  %v214_v2 = vld [vmem:[%s293_s1 + $0x8] sm:$0xff]  }
   0x2   :  { %204 = vmatpush3.bf16.msra.mxu0 %v213_v1  ;;  %v215_v3 = vld [vmem:[%s294_s0] sm:$0xff]  }
   0x3   :  { %205 = vmatprep.subr.bf16.mxu0 %v220_v0  ;;  %v197_v12 = vld [vmem:[%s295_s3] sm:$0xff]  }
   0x4   :  { %v189_v13 = vld [vmem:[%s296_s2] ss:$0 sm:$0xff]  ;;  %v198_v14 = vunpack.c.l.bf16 %v197_v12  ;;  %v199_v17 = vunpack.c.h.bf16 %v197_v12 }
   0x5   :  { %v190_v41 = vld [vmem:[%s297_s4] ss:$0 sm:$0xff] }
   0x6   :  { %206 = vmatpush3.bf16.msra.mxu0 %v214_v2  ;;  %v191_v43 = vld [vmem:[%s298_s5] ss:$0 sm:$0xff] }
   0x8   :  { %v31_v4 = vld [vmem:[#allocation2] sm:$0xff]  ;;  %v32_v6 = vld [vmem:[#allocation2 + $0x8] sm:$0xff] }
   0x9   :  { %208 = vmatmul.mubr.msk.bf16.vlgmr.msra.gmra.mrb[0].mxu0 %vm28_vm0, %v215_v3 }
  0xdc   :  { %v94_v5 = vpop.f32.mrb[0].mxu0 }
  0xdd   :  { %v101_v7 = vadd.f32 %v94_v5, %v31_v4  ;;  %v209_v8 = vpop.f32.mrb[1].mxu0 }
  0xde   :  { %v97_v9 = vpop.f32.mrb[2].mxu0 }
  0xdf   :  { %103 = vst.msk [vmem:[#allocation2] sm:$0xff] %vm28_vm0, %v101_v7  ;;  %v102_v10 = vadd.f32 %v97_v9, %v32_v6  ;;  %v210_v11 = vpop.f32.mrb[3].mxu0 }
  0xe1   :  { %104 = vst.msk [vmem:[#allocation2 + $0x8] sm:$0xff] %vm28_vm0, %v102_v10 }
  0xe6   :  { %v108_v15 = vld [vmem:[#allocation2] sm:$0xff] }
  0xe7   :  { %v117_v16 = vadd.f32 %v189_v13, %v108_v15 }
  0xe8   :  { %v109_v18 = vld [vmem:[#allocation2 + $0x8] sm:$0xff] }
  0xe9   :  { %v123_v19 = vadd.f32 %v198_v14, %v117_v16  ;;  %v118_v20 = vadd.f32 %v189_v13, %v109_v18 }
  0xeb   :  { %v125_v21 = vsel %vm28_vm0, %v123_v19, 0.0  ;;  %v124_v22 = vadd.f32 %v199_v17, %v118_v20 }
  0xec   :  { %126 = vadd.xlane.f32.xlu0 %v125_v21 }
  0xed   :  { %v128_v23 = vsel %vm28_vm0, %v124_v22, 0.0 }
  0xf0   :  { %129 = vadd.xlane.f32.xlu0 %v128_v23 }
 0x179   :  { %v127_v24 = vpop.xlane.xlu0 %126 }
 0x17a   :  { %v132_v25 = vmul.f32 0.03125, %v127_v24 }
 0x17c   :  { %v134_v26 = vsub.f32 %v123_v19, %v132_v25 }
 0x17d   :  { %v130_v27 = vpop.xlane.xlu0 %129 }
 0x17e   :  { %v133_v28 = vmul.f32 0.03125, %v130_v27  ;;  %v136_v29 = vmul.f32 %v134_v26, %v134_v26 }
 0x180   :  { %v135_v30 = vsub.f32 %v124_v22, %v133_v28  ;;  %v138_v31 = vsel %vm28_vm0, %v136_v29, 0.0 }
 0x181   :  { %139 = vadd.xlane.f32.xlu1 %v138_v31 }
 0x182   :  { %v137_v32 = vmul.f32 %v135_v30, %v135_v30 }
 0x184   :  { %v141_v33 = vsel %vm28_vm0, %v137_v32, 0.0 }
 0x185   :  { %142 = vadd.xlane.f32.xlu1 %v141_v33 }
 0x20e   :  { %v140_v34 = vpop.xlane.xlu1 %139 }
 0x20f   :  { %v144_v35 = vmul.f32 0.03125, %v140_v34 }
 0x211   :  { %v146_v36 = vadd.f32 1e-12, %v144_v35 }
 0x212   :  { %v143_v37 = vpop.xlane.xlu1 %142 }
 0x213   :  { %216 = vrsqrt.f32 %v146_v36  ;;  %v145_v38 = vmul.f32 0.03125, %v143_v37 }
 0x215   :  { %v147_v39 = vadd.f32 1e-12, %v145_v38 }
 0x217   :  { %218 = vrsqrt.f32 %v147_v39 }
 0x21d   :  { %v217_v40 = vpop.eup %216 }
 0x21e   :  { %v150_v42 = vmul.f32 %v217_v40, %v134_v26 }
 0x220   :  { %v159_v44 = vmul.f32 %v190_v41, %v150_v42 }
 0x221   :  { %v219_v45 = vpop.eup %218 }
 0x222   :  { %v168_v46 = vadd.f32 %v191_v43, %v159_v44  ;;  %v151_v47 = vmul.f32 %v219_v45, %v135_v30 }
 0x224   :  { %v194_v48 = vpack.c.bf16 %v168_v46, %v168_v46  ;;  %v160_v49 = vmul.f32 %v190_v41, %v151_v47 }
 0x226   :  { %179 = vst.msk [vmem:[%s299_s6] sm:$0xf] %vm178_vm2, %v194_v48  ;;  %v169_v50 = vadd.f32 %v191_v43, %v160_v49 }
 0x228   :  { %v195_v51 = vpack.c.bf16 %v169_v50, %v169_v50 }
 0x22a   :  { %180 = vst.msk [vmem:[%s299_s6 + $0x4] sm:$0xf] %vm178_vm2, %v195_v51 }

// kernel: bert_with_head_forward.14
= control target key start
LH: loop header
LB: loop body
LE: loop exit
PB: predicated region body
PF: predicated region fallthrough
CT: control target
= control target key end

     0   :  { %s565_s9 = smov 0   ;;  %s616_s0 = inlined_call_operand.vmem [shape: bf16[2,8,96], index: 0, kind: input, shape index: {}]   ;;  %s617_s1 = inlined_call_operand.vmem [shape: f32[2,1,8], index: 1, kind: input, shape index: {}]   ;;  %s618_s2 = inlined_call_operand.vmem [shape: bf16[2,8,32], index: 2, kind: output, shape index: {}]  }
   0x1 LB: > { %s461_s10 = sadd.s32 4294967295, %s540_s9   ;;  %p465_p0 = scmp.ge.s32.totalorder %s540_s9, 1  ;;  %s540_s9 = sphi %s565_s9, %s12_s9  }
   0x2   : > { %p119_p1 = scmp.lt.s32.totalorder %s540_s9, 3 }
   0x4   : > { %p120_p2 = pnand %p465_p0, %p119_p1 }
   0x5   : > { %p142_p3 = scmp.lt.s32.totalorder (!%p120_p2), %s461_s10, 1  ;;  %v542_v0 = vmov (!%p120_p2), 0.0   ;;  %vm543_vm0 = vmmov (!%p120_p2), 0   ;;  %s544_s15 = smov (!%p120_p2), 96   ;;  %vm169_vm1 = vcmask (!%p120_p2), 130048   ;;  %vm216_vm2 = vcmask (!%p120_p2), 64512  }
   0x6   : > { %123 = sbr.rel (%p120_p2) target bundleno = 1541 (0x605), region = 28  ;;  %485 = vmatprep.subr.bf16.mxu0 (!%p120_p2), %v542_v0  ;;  %487 = vmatprep.mubr.msk.bf16.mxu0 (!%p120_p2), %vm543_vm0, %v542_v0  ;;  %s545_s16 = smov (!%p120_p2), 64   ;;  %vm234_vm3 = vcmask (!%p120_p2), 1043456   ;;  %vm397_vm4 = vcmask (!%p120_p2), 257024  }
   0x7   : > { %491 = vmatprep.subr.bf16.mxu1 (!%p120_p2), %v542_v0  ;;  %493 = vmatprep.mubr.msk.bf16.mxu1 (!%p120_p2), %vm543_vm0, %v542_v0  ;;  %s546_s20 = smov (!%p120_p2), 80   ;;  %s547_s21 = smov (!%p120_p2), 112  }
   0x8   : > { %s548_s22 = smov (!%p120_p2), 48   ;;  %s549_s23 = smov (!%p120_p2), 16  }
   0xd   : > { %s620_s10 = smov (!%p142_p3, %s461_s10), 1 }
   0xe   : > { %s466_s11 = sshll.u32 %s620_s10, 2  ;;  %s148_s19 = scalar_lea.vmem %s617_s1, %s620_s10 }
   0xf   : > { %s145_s14 = scalar_lea.vmem %s616_s0, %s466_s11  ;;  %v468_v6 = vld [vmem:[%s148_s19] ss:$0 sm:$0xff]  ;;  %s152_s26 = scalar_lea.vmem %s618_s2, %s466_s11 }
  0x10   : > { %v155_v1 = vld [vmem:[%s145_s14] sm:$0xf] }
  0x11   : > { %v583_v2 = vcombine.low %v155_v1, %v155_v1  ;;  %v157_v5 = vmul.bf16 1048592000, %v155_v1 }
  0x13   : > { %167 = vrot.lane.b32.xlu0 %v583_v2, %s544_s15  ;;  %229 = vrot.lane.b32.xlu1 %v583_v2, %s545_s16  ;;  %v472_v20 = vcombine.low %v157_v5, %v157_v5 }
  0x85   : > { %v168_v3 = vpop.permute.xlu0 %167  ;;  %v230_v13 = vpop.permute.xlu1 %229 }
  0x86   : > { %v174_v4 = vsel %vm169_vm1, %v168_v3, 0  ;;  %v236_v14 = vsel %vm234_vm3, %v230_v13, 0 }
  0x87   : > { %486 = vmatpush3.bf16.xpose.msra.mxu0 %v174_v4  ;;  %492 = vmatpush3.bf16.msra.mxu1 %v236_v14 }
  0x88   : > { %503 = vmatprep.subr.bf16.mxu0 %v542_v0  ;;  %497 = vmatprep.subr.bf16.mxu1 %v542_v0 }
  0x8e   : > { %488 = vmatmul.mubr.msk.bf16.vlgmr.msra.gmra.mrb[0].mxu0 %vm169_vm1, %v157_v5 }
  0x8f   : > { %505 = vmatprep.mubr.msk.bf16.mxu0 %vm543_vm0, %v542_v0 }
 0x161   : > { %v210_v7 = vpop.f32.mrb[0].mxu0 }
 0x162   : > { %v211_v8 = vadd.f32 %v468_v6, %v210_v7  ;;  %v489_v9 = vpop.f32.mrb[1].mxu0 }
 0x163   : > { %v213_v10 = vpop.f32.mrb[2].mxu0 }
 0x164   : > { %v490_v11 = vpop.f32.mrb[3].mxu0  ;;  %v217_v12 = vsel %vm216_vm2, %v211_v8, -inf }
 0x165   : > { %218 = vmax.xlane.f32.xlu0 %v217_v12 }
 0x1f2   : > { %v219_v15 = vpop.xlane.xlu0 %218 }
 0x1f3   : > { %v220_v16 = vsub.f32 %v211_v8, %v219_v15 }
 0x1f5   : > { %v221_v17 = vmul.f32 1.442695, %v220_v16 }
 0x1f7   : > { %526 = vpow2.f32 %v221_v17 }
 0x201   : > { %v527_v18 = vpop.eup %526 }
 0x202   : > { %v223_v19 = vsel %vm216_vm2, %v527_v18, 0.0 }
 0x203   : > { %224 = vadd.xlane.f32.xlu1 %v223_v19 }
 0x214   : > { %283 = vrot.lane.b32.xlu1 %v583_v2, %s546_s20 }
 0x218   : > { %281 = vrot.lane.b32.xlu1 %v472_v20, %s547_s21 }
 0x290   : > { %v225_v21 = vpop.xlane.xlu1 %224 }
 0x291   : > { %528 = vrcp.f32 %v225_v21 }
 0x294   : > { %v284_v23 = vpop.permute.xlu1 %283 }
 0x295   : > { %v289_v25 = vsel %vm169_vm1, %v284_v23, 0 }
 0x298   : > { %v282_v27 = vpop.permute.xlu1 %281 }
 0x29b   : > { %v529_v22 = vpop.eup %528 }
 0x29c   : > { %v227_v24 = vmul.f32 %v529_v22, %v527_v18 }
 0x29e   : > { %v228_v26 = vpack.c.bf16 %v227_v24, %v227_v24 }
 0x2a0   : > { %494 = vmatmul.mubr.msk.bf16.vlgmr.msra.gmra.mrb[0].mxu1 %vm216_vm2, %v228_v26 }
 0x2a1   : > { %498 = vmatpush3.bf16.xpose.msra.mxu1 %v289_v25  ;;  %499 = vmatprep.mubr.msk.bf16.mxu1 %vm543_vm0, %v542_v0 }
 0x2a8   : > { %500 = vmatmul.mubr.msk.bf16.vlgmr.msra.gmra.mrb[4].mxu1 %vm169_vm1, %v282_v27 }
 0x373   : > { %v272_v28 = vpop.f32.mrb[0].mxu1 }
 0x374   : > { %v495_v29 = vpop.f32.mrb[1].mxu1 }
 0x375   : > { %v275_v30 = vpop.f32.mrb[2].mxu1 }
 0x376   : > { %v496_v31 = vpop.f32.mrb[3].mxu1 }
 0x37b   : > { %v325_v32 = vpop.f32.mrb[4].mxu1 }
 0x37c   : > { %v326_v33 = vadd.f32 %v468_v6, %v325_v32  ;;  %v501_v34 = vpop.f32.mrb[5].mxu1 }
 0x37d   : > { %v328_v35 = vpop.f32.mrb[6].mxu1 }
 0x37e   : > { %v502_v36 = vpop.f32.mrb[7].mxu1  ;;  %v331_v37 = vsel %vm216_vm2, %v326_v33, -inf }
 0x37f   : > { %332 = vmax.xlane.f32.xlu1 %v331_v37 }
 0x40c   : > { %v333_v38 = vpop.xlane.xlu1 %332 }
 0x40d   : > { %v334_v39 = vsub.f32 %v326_v33, %v333_v38 }
 0x40f   : > { %v335_v40 = vmul.f32 1.442695, %v334_v39 }
 0x411   : > { %530 = vpow2.f32 %v335_v40 }
 0x41b   : > { %v531_v41 = vpop.eup %530 }
 0x41c   : > { %v337_v42 = vsel %vm216_vm2, %v531_v41, 0.0 }
 0x41d   : > { %338 = vadd.xlane.f32.xlu0 %v337_v42 }
 0x433   : > { %343 = vrot.lane.b32.xlu0 %v583_v2, %s548_s22 }
 0x4aa   : > { %v339_v43 = vpop.xlane.xlu0 %338 }
 0x4ab   : > { %532 = vrcp.f32 %v339_v43 }
 0x4ae   : > { %v344_v44 = vpop.permute.xlu0 %343 }
 0x4af   : > { %v349_v45 = vsel %vm234_vm3, %v344_v44, 0 }
 0x4b0   : > { %504 = vmatpush3.bf16.msra.mxu0 %v349_v45 }
 0x4b5   : > { %v533_v46 = vpop.eup %532 }
 0x4b6   : > { %v341_v47 = vmul.f32 %v533_v46, %v531_v41 }
 0x4b8   : > { %v342_v48 = vpack.c.bf16 %v341_v47, %v341_v47 }
 0x4ba   : > { %506 = vmatmul.mubr.msk.bf16.vlgmr.msra.gmra.mrb[4].mxu0 %vm216_vm2, %v342_v48 }
 0x58d   : > { %v385_v49 = vpop.f32.mrb[4].mxu0 }
 0x58e   : > { %392 = vrot.lane.b32.xlu0 %v385_v49, %s549_s23  ;;  %v507_v50 = vpop.f32.mrb[5].mxu0 }
 0x58f   : > { %v388_v51 = vpop.f32.mrb[6].mxu0 }
 0x590   : > { %v508_v52 = vpop.f32.mrb[7].mxu0 }
 0x600   : > { %v393_v53 = vpop.permute.xlu0 %392 }
 0x601   : > { %v395_v54 = vsel %vm169_vm1, %v272_v28, %v393_v53 }
 0x602   : > { %v396_v55 = vpack.c.bf16 %v395_v54, %v395_v54 }
 0x604   : > { %398 = vst.msk [vmem:[%s152_s26] sm:$0xf] %vm397_vm4, %v396_v55 }
 0x605 PF: > { %s12_s9 = sadd.s32 1, %s540_s9  }
 0x606   : > { %p9_p4 = scmp.ge.s32.totalorder %s12_s9, 4  }
 0x608   :  { %11 = sbr.rel (!%p9_p4) target bundleno = 1 (0x1), region = 61 }

// kernel: bert_with_head_forward.16
= control target key start
LH: loop header
LB: loop body
LE: loop exit
PB: predicated region body
PF: predicated region fallthrough
CT: control target
= control target key end

     0   :  { %vm19_vm0 = vcmask 523264   ;;  %v173_v0 = vmov 0.0   ;;  %vm174_vm1 = vmmov 0   ;;  %vm47_vm2 = vcmask 261120   ;;  %s217_s1 = inlined_call_operand.vmem [shape: bf16[32,64], index: 1, kind: input, shape index: {}]   ;;  %s218_s0 = inlined_call_operand.vmem [shape: bf16[16,32], index: 0, kind: input, shape index: {}]   ;;  %s219_s2 = inlined_call_operand.vmem [shape: f32[1,64], index: 2, kind: input, shape index: {}]   ;;  %s220_s3 = inlined_call_operand.vmem [shape: bf16[16,64], index: 3, kind: output, shape index: {}]  }
   0x1   :  { %156 = vmatprep.subr.bf16.mxu0 %v173_v0  ;;  %v166_v1 = vld [vmem:[%s217_s1] sm:$0xff]   ;;  %160 = vmatprep.mubr.msk.bf16.mxu0 %vm174_vm1, %v173_v0  ;;  %20 = vst.msk [vmem:[#allocation2] sm:$0xff] %vm19_vm0, %v173_v0  ;;  %21 = vst.msk [vmem:[#allocation2 + $0x8] sm:$0xff] %vm19_vm0, %v173_v0  ;;  %v167_v2 = vld [vmem:[%s217_s1 + $0x8] sm:$0xff]   ;;  %vm137_vm3 = vcmask 519168  }
   0x2   :  { %157 = vmatpush3.bf16.msra.mxu0 %v166_v1  ;;  %v168_v3 = vld [vmem:[%s218_s0] sm:$0xff]  }
   0x3   :  { %158 = vmatprep.subr.bf16.mxu0 %v173_v0  ;;  %v148_v12 = vld [vmem:[%s219_s2] ss:$0 sm:$0xff] }
   0x6   :  { %159 = vmatpush3.bf16.msra.mxu0 %v167_v2 }
   0x8   :  { %v22_v4 = vld [vmem:[#allocation2] sm:$0xff]  ;;  %v23_v6 = vld [vmem:[#allocation2 + $0x8] sm:$0xff] }
   0x9   :  { %161 = vmatmul.mubr.msk.bf16.vlgmr.msra.gmra.mrb[0].mxu0 %vm47_vm2, %v168_v3 }
  0xdc   :  { %v85_v5 = vpop.f32.mrb[0].mxu0 }
  0xdd   :  { %v92_v7 = vadd.f32 %v85_v5, %v22_v4  ;;  %v162_v8 = vpop.f32.mrb[1].mxu0 }
  0xde   :  { %v88_v9 = vpop.f32.mrb[2].mxu0 }
  0xdf   :  { %95 = vst.msk [vmem:[#allocation2] sm:$0xff] %vm19_vm0, %v92_v7  ;;  %v93_v10 = vadd.f32 %v88_v9, %v23_v6  ;;  %v163_v11 = vpop.f32.mrb[3].mxu0 }
  0xe1   :  { %96 = vst.msk [vmem:[#allocation2 + $0x8] sm:$0xff] %vm19_vm0, %v93_v10 }
  0xe6   :  { %v100_v13 = vld [vmem:[#allocation2] sm:$0xff] }
  0xe7   :  { %v109_v14 = vadd.f32 %v148_v12, %v100_v13 }
  0xe8   :  { %v101_v15 = vld [vmem:[#allocation2 + $0x8] sm:$0xff] }
  0xe9   :  { %v113_v16 = vmul.f32 0.044715, %v109_v14  ;;  %v110_v17 = vadd.f32 %v148_v12, %v101_v15  ;;  %v111_v28 = vmul.f32 0.5, %v109_v14 }
  0xeb   :  { %v115_v18 = vmul.f32 %v113_v16, %v109_v14  ;;  %v114_v19 = vmul.f32 0.044715, %v110_v17  ;;  %v112_v32 = vmul.f32 0.5, %v110_v17 }
  0xed   :  { %v117_v20 = vmul.f32 %v115_v18, %v109_v14  ;;  %v116_v21 = vmul.f32 %v114_v19, %v110_v17 }
  0xef   :  { %v119_v22 = vadd.f32 %v117_v20, %v109_v14  ;;  %v118_v23 = vmul.f32 %v116_v21, %v110_v17 }
  0xf1   :  { %v121_v24 = vmul.f32 0.7978846, %v119_v22  ;;  %v120_v25 = vadd.f32 %v118_v23, %v110_v17 }
  0xf3   :  { %169 = vtanh.f32 %v121_v24  ;;  %v122_v26 = vmul.f32 0.7978846, %v120_v25 }
  0xf5   :  { %171 = vtanh.f32 %v122_v26 }
  0xfd   :  { %v170_v27 = vpop.eup %169 }
  0xfe   :  { %v125_v29 = vadd.f32 1.0, %v170_v27 }
  0xff   :  { %v172_v30 = vpop.eup %171 }
 0x100   :  { %v127_v31 = vmul.f32 %v125_v29, %v111_v28  ;;  %v126_v33 = vadd.f32 1.0, %v172_v30 }
 0x102   :  { %v151_v34 = vpack.c.bf16 %v127_v31, %v127_v31  ;;  %v128_v35 = vmul.f32 %v126_v33, %v112_v32 }
 0x104   :  { %138 = vst.msk [vmem:[%s220_s3] sm:$0xf] %vm137_vm3, %v151_v34  ;;  %v152_v36 = vpack.c.bf16 %v128_v35, %v128_v35 }
 0x106   :  { %139 = vst.msk [vmem:[%s220_s3 + $0x4] sm:$0xf] %vm137_vm3, %v152_v36 }

// kernel: bert_with_head_forward.23
= control target key start
LH: loop header
LB: loop body
LE: loop exit
PB: predicated region body
PF: predicated region fallthrough
CT: control target
= control target key end

     0   :  { %v253_v1 = vmov 0.0   ;;  %vm254_vm0 = vmmov 0   ;;  %s324_s0 = inlined_call_operand.vmem [shape: bf16[2,32], index: 0, kind: input, shape index: {}]   ;;  %s325_s1 = inlined_call_operand.vmem [shape: bf16[32,32], index: 1, kind: input, shape index: {}]   ;;  %s326_s2 = inlined_call_operand.vmem [shape: f32[1,32], index: 2, kind: input, shape index: {}]   ;;  %s327_s3 = inlined_call_operand.vmem [shape: bf16[32,2], index: 3, kind: input, shape index: {}]   ;;  %s328_s4 = inlined_call_operand.vmem [shape: f32[1,2], index: 4, kind: input, shape index: {}]   ;;  %s329_s5 = inlined_call_operand.hbm [shape: f32[2,2], index: 5, kind: output, shape index: {}]  }
   0x1   :  { %v219_v0 = vld [vmem:[%s325_s1] sm:$0xff]   ;;  %200 = vmatprep.subr.bf16.mxu0 %v253_v1  ;;  %208 = vmatprep.subr.bf16.mxu1 %v253_v1  ;;  %v220_v2 = vld [vmem:[%s325_s1 + $0x8] sm:$0xff]  }
   0x2   :  { %201 = vmatpush3.bf16.msra.mxu0 %v219_v0  ;;  %204 = vmatprep.mubr.msk.bf16.mxu0 %vm254_vm0, %v253_v1 }
   0x3   :  { %202 = vmatprep.subr.bf16.mxu0 %v253_v1  ;;  %212 = vmatprep.mubr.msk.bf16.mxu1 %vm254_vm0, %v253_v1 }
   0x4   :  { %10 = vsyncpa [#allocation3], 0  ;;  %v22_v3 = vld [vmem:[%s324_s0] sm:$0x1]  ;;  %vm46_vm1 = vcmask 261120   ;;  %v222_v5 = vld [vmem:[%s327_s3 + $0x8] sm:$0xff]  }
   0x5   :  { %v221_v4 = vld [vmem:[%s327_s3] sm:$0xff]   ;;  %vm159_vm2 = vcmask 9216  }
   0x6   :  { %203 = vmatpush3.bf16.msra.mxu0 %v220_v2  ;;  %209 = vmatpush3.bf16.msra.mxu1 %v221_v4  ;;  %v186_v6 = vld [vmem:[%s326_s2] ss:$0 sm:$0xff]  ;;  %s255_s2 = smov [#allocation2]  }
   0x7   :  { %210 = vmatprep.subr.bf16.mxu1 %v253_v1  ;;  %v190_v14 = vld [vmem:[%s328_s4] ss:$0 sm:$0xff]  ;;  %s178_s3 = sshll.u32 %s255_s2, 4  ;;  %s179_s3 = int_to_ptr.vmem [resolvable:$true] %s178_s3 }
   0x8   :  { %s229_s4 = scalar_lea.vmem %s179_s3, 32  ;;  %p234_p1 = scmp.lt.s32.totalorder %s179_s3, %s179_s3 }
   0x9   :  { %205 = vmatmul.mubr.msk.bf16.vlgmr.msra.gmra.mrb[0].mxu0 %vm46_vm1, %v22_v3  ;;  %p230_p0 = scmp.ne.s32.totalorder %s179_s3, %s229_s4  ;;  %p235_p2 = scmp.lt.s32.totalorder %s229_s4, %s229_s4 }
   0xa   :  { %211 = vmatpush3.bf16.msra.mxu1 %v222_v5 }
   0xb   :  { %p236_p3 = por %p235_p2, %p234_p1 }
   0xd   :  { %p237_p4 = pnand %p236_p3, %p230_p0 }
  0xdc   :  { %v84_v7 = vpop.f32.mrb[0].mxu0 }
  0xdd   :  { %v85_v8 = vadd.f32 %v186_v6, %v84_v7  ;;  %v206_v9 = vpop.f32.mrb[1].mxu0 }
  0xde   :  { %v87_v10 = vpop.f32.mrb[2].mxu0 }
  0xdf   :  { %223 = vtanh.f32 %v85_v8  ;;  %v207_v11 = vpop.f32.mrb[3].mxu0 }
  0xe9   :  { %v224_v12 = vpop.eup %223 }
  0xea   :  { %v91_v13 = vpack.c.bf16 %v224_v12, %v224_v12 }
  0xec   :  { %213 = vmatmul.mubr.msk.bf16.vlgmr.msra.gmra.mrb[0].mxu1 %vm46_vm1, %v91_v13 }
 0x1bf   :  { %v152_v15 = vpop.f32.mrb[0].mxu1 }
 0x1c0   :  { %v153_v16 = vadd.f32 %v190_v14, %v152_v15  ;;  %v214_v17 = vpop.f32.mrb[1].mxu1 }
 0x1c1   :  { %v155_v18 = vpop.f32.mrb[2].mxu1 }
 0x1c2   :  { %v158_v19 = vmax.f32 %v153_v16, 0.0  ;;  %v215_v20 = vpop.f32.mrb[3].mxu1 }
 0x1c4   :  { %v160_v21 = vsel %vm159_vm2, %v158_v19, -inf }
 0x1c5   :  { %161 = vmax.xlane.f32.xlu0 %v160_v21 }
 0x252   :  { %v162_v22 = vpop.xlane.xlu0 %161 }
 0x253   :  { %v163_v23 = vsub.f32 %v158_v19, %v162_v22 }
 0x255   :  { %v164_v24 = vmul.f32 1.442695, %v163_v23 }
 0x257   :  { %225 = vpow2.f32 %v164_v24 }
 0x261   :  { %v226_v25 = vpop.eup %225 }
 0x262   :  { %v166_v26 = vsel %vm159_vm2, %v226_v25, 0.0 }
 0x263   :  { %167 = vadd.xlane.f32.xlu0 %v166_v26 }
 0x2f0   :  { %v168_v27 = vpop.xlane.xlu0 %167 }
 0x2f1   :  { %227 = vrcp.f32 %v168_v27 }
 0x2fb   :  { %v228_v28 = vpop.eup %227 }
 0x2fc   :  { %v170_v29 = vmul.f32 %v228_v28, %v226_v25 }
 0x2fe   :  { %171 = vst.msk [vmem:[#allocation2] sm:$0x3] %vm159_vm2, %v170_v29 }
 0x2ff   :  { %240 = shalt.err (!%p237_p4)
}
 0x300   :  { %s241_s7 = scalar_lea.hbm %s329_s5, 32 }
 0x301   :  { %p242_p5 = scmp.ne.s32.totalorder %s329_s5, %s241_s7  ;;  %p245_p6 = scmp.lt.u32.totalorder %s241_s7, %s329_s5 }
 0x303   :  { %p247_p7 = pnand %p245_p6, %p242_p5 }
 0x305   :  { %250 = shalt.err (!%p247_p7)
}
 0x306   :  { %181 = dma.vmem_to_hbm [thread:$0]  %s179_s3, 32, %s329_s5, [#allocation3]  }
 0x307   :  { %251 = dma.done.wait [#allocation3], 32  }
 0x308   :  { %252 = vsyncadd [#allocation3], 4294967264 }
 0x309   :  { %185 = vsyncpa [#allocation3], 1 }

// kernel: bert_with_head_forward.17
= control target key start
LH: loop header
LB: loop body
LE: loop exit
PB: predicated region body
PF: predicated region fallthrough
CT: control target
= control target key end

     0   :  { %vm28_vm0 = vcmask 261120   ;;  %v247_v0 = vmov 0.0   ;;  %vm248_vm1 = vmmov 0   ;;  %vm72_vm2 = vcmask 523264   ;;  %s325_s1 = inlined_call_operand.vmem [shape: bf16[64,32], index: 1, kind: input, shape index: {}]   ;;  %s326_s0 = inlined_call_operand.vmem [shape: bf16[16,64], index: 0, kind: input, shape index: {}]   ;;  %s327_s3 = inlined_call_operand.vmem [shape: bf16[16,32], index: 3, kind: input, shape index: {}]   ;;  %s328_s2 = inlined_call_operand.vmem [shape: f32[1,32], index: 2, kind: input, shape index: {}]   ;;  %s329_s4 = inlined_call_operand.vmem [shape: f32[1,32], index: 4, kind: input, shape index: {}]   ;;  %s330_s5 = inlined_call_operand.vmem [shape: f32[1,32], index: 5, kind: input, shape index: {}]   ;;  %s331_s6 = inlined_call_operand.vmem [shape: bf16[16,32], index: 6, kind: output, shape index: {}]  }
   0x1   :  { %224 = vmatprep.subr.bf16.mxu0 %v247_v0  ;;  %v238_v1 = vld [vmem:[%s325_s1] sm:$0xff]   ;;  %232 = vmatprep.mubr.msk.bf16.mxu0 %vm248_vm1, %v247_v0  ;;  %29 = vst.msk [vmem:[#allocation2] sm:$0xff] %vm28_vm0, %v247_v0  ;;  %30 = vst.msk [vmem:[#allocation2 + $0x8] sm:$0xff] %vm28_vm0, %v247_v0  ;;  %v239_v2 = vld [vmem:[%s325_s1 + $0x8] sm:$0xff]   ;;  %vm195_vm3 = vcmask 257024  }
   0x2   :  { %225 = vmatpush3.bf16.msra.mxu0 %v238_v1  ;;  %v240_v3 = vld [vmem:[%s325_s1 + $0x10] sm:$0xff]   ;;  %v241_v4 = vld [vmem:[%s325_s1 + $0x18] sm:$0xff]   ;;  %v242_v5 = vld [vmem:[%s326_s0] sm:$0xff]  }
   0x3   :  { %226 = vmatprep.subr.bf16.mxu0 %v247_v0  ;;  %v216_v14 = vld [vmem:[%s327_s3] sm:$0xff]  }
   0x4   :  { %v208_v15 = vld [vmem:[%s328_s2] ss:$0 sm:$0xff]  ;;  %v217_v16 = vunpack.c.l.bf16 %v216_v14  ;;  %v218_v19 = vunpack.c.h.bf16 %v216_v14 }
   0x5   :  { %v209_v43 = vld [vmem:[%s329_s4] ss:$0 sm:$0xff] }
   0x6   :  { %227 = vmatpush3.bf16.msra.mxu0 %v239_v2  ;;  %v210_v45 = vld [vmem:[%s330_s5] ss:$0 sm:$0xff] }
   0x7   :  { %228 = vmatprep.subr.bf16.mxu0 %v247_v0 }
   0x8   :  { %v31_v6 = vld [vmem:[#allocation2] sm:$0xff]  ;;  %v32_v8 = vld [vmem:[#allocation2 + $0x8] sm:$0xff] }
   0xa   :  { %229 = vmatpush3.bf16.msra.mxu0 %v240_v3 }
   0xb   :  { %230 = vmatprep.subr.bf16.mxu0 %v247_v0 }
   0xe   :  { %231 = vmatpush3.bf16.msra.mxu0 %v241_v4 }
  0x11   :  { %233 = vmatmul.mubr.msk.bf16.vlgmr.msra.gmra.mrb[0].mxu0 %vm72_vm2, %v242_v5 }
  0xe4   :  { %v110_v7 = vpop.f32.mrb[0].mxu0 }
  0xe5   :  { %v117_v9 = vadd.f32 %v110_v7, %v31_v6  ;;  %v234_v10 = vpop.f32.mrb[1].mxu0 }
  0xe6   :  { %v113_v11 = vpop.f32.mrb[2].mxu0 }
  0xe7   :  { %120 = vst.msk [vmem:[#allocation2] sm:$0xff] %vm28_vm0, %v117_v9  ;;  %v118_v12 = vadd.f32 %v113_v11, %v32_v8  ;;  %v235_v13 = vpop.f32.mrb[3].mxu0 }
  0xe9   :  { %121 = vst.msk [vmem:[#allocation2 + $0x8] sm:$0xff] %vm28_vm0, %v118_v12 }
  0xee   :  { %v125_v17 = vld [vmem:[#allocation2] sm:$0xff] }
  0xef   :  { %v134_v18 = vadd.f32 %v208_v15, %v125_v17 }
  0xf0   :  { %v126_v20 = vld [vmem:[#allocation2 + $0x8] sm:$0xff] }
  0xf1   :  { %v140_v21 = vadd.f32 %v217_v16, %v134_v18  ;;  %v135_v22 = vadd.f32 %v208_v15, %v126_v20 }
  0xf3   :  { %v142_v23 = vsel %vm28_vm0, %v140_v21, 0.0  ;;  %v141_v24 = vadd.f32 %v218_v19, %v135_v22 }
  0xf4   :  { %143 = vadd.xlane.f32.xlu0 %v142_v23 }
  0xf5   :  { %v145_v25 = vsel %vm28_vm0, %v141_v24, 0.0 }
  0xf8   :  { %146 = vadd.xlane.f32.xlu0 %v145_v25 }
 0x181   :  { %v144_v26 = vpop.xlane.xlu0 %143 }
 0x182   :  { %v149_v27 = vmul.f32 0.03125, %v144_v26 }
 0x184   :  { %v151_v28 = vsub.f32 %v140_v21, %v149_v27 }
 0x185   :  { %v147_v29 = vpop.xlane.xlu0 %146 }
 0x186   :  { %v150_v30 = vmul.f32 0.03125, %v147_v29  ;;  %v153_v31 = vmul.f32 %v151_v28, %v151_v28 }
 0x188   :  { %v152_v32 = vsub.f32 %v141_v24, %v150_v30  ;;  %v155_v33 = vsel %vm28_vm0, %v153_v31, 0.0 }
 0x189   :  { %156 = vadd.xlane.f32.xlu1 %v155_v33 }
 0x18a   :  { %v154_v34 = vmul.f32 %v152_v32, %v152_v32 }
 0x18c   :  { %v158_v35 = vsel %vm28_vm0, %v154_v34, 0.0 }
 0x18d   :  { %159 = vadd.xlane.f32.xlu1 %v158_v35 }
 0x216   :  { %v157_v36 = vpop.xlane.xlu1 %156 }
 0x217   :  { %v161_v37 = vmul.f32 0.03125, %v157_v36 }
 0x219   :  { %v163_v38 = vadd.f32 1e-12, %v161_v37 }
 0x21a   :  { %v160_v39 = vpop.xlane.xlu1 %159 }
 0x21b   :  { %243 = vrsqrt.f32 %v163_v38  ;;  %v162_v40 = vmul.f32 0.03125, %v160_v39 }
 0x21d   :  { %v164_v41 = vadd.f32 1e-12, %v162_v40 }
 0x21f   :  { %245 = vrsqrt.f32 %v164_v41 }
 0x225   :  { %v244_v42 = vpop.eup %243 }
 0x226   :  { %v167_v44 = vmul.f32 %v244_v42, %v151_v28 }
 0x228   :  { %v176_v46 = vmul.f32 %v209_v43, %v167_v44 }
 0x229   :  { %v246_v47 = vpop.eup %245 }
 0x22a   :  { %v185_v48 = vadd.f32 %v210_v45, %v176_v46  ;;  %v168_v49 = vmul.f32 %v246_v47, %v152_v32 }
 0x22c   :  { %v213_v50 = vpack.c.bf16 %v185_v48, %v185_v48  ;;  %v177_v51 = vmul.f32 %v209_v43, %v168_v49 }
 0x22e   :  { %196 = vst.msk [vmem:[%s331_s6] sm:$0xf] %vm195_vm3, %v213_v50  ;;  %v186_v52 = vadd.f32 %v210_v45, %v177_v51 }
 0x230   :  { %v214_v53 = vpack.c.bf16 %v186_v52, %v186_v52 }
 0x232   :  { %197 = vst.msk [vmem:[%s331_s6 + $0x4] sm:$0xf] %vm195_vm3, %v214_v53 }

</bundles_post_ra>
